<compile_context>
chip_gen: v5e
topology: v5e:2x2
jax: 0.10.0
libtpu: 0.0.40
codegen_flags: <defaults>
</compile_context>

<pallas_src>
import functools
import math

import jax
import jax.numpy as jnp
from jax.experimental import pallas as pl
from jax.experimental.pallas import tpu as pltpu

LN_EPS = 1e-12          # HF BERT layer_norm_eps
NEG_BIAS = -1.0e9       # additive mask bias (robust, per review)


def _gelu(x):
    # TODO(synk): HF BERT uses exact erf-GELU; tanh approximation kept for
    # guaranteed Mosaic lowering (matches reference to ~1e-3).
    c = math.sqrt(2.0 / math.pi)
    return 0.5 * x * (1.0 + jnp.tanh(c * (x + 0.044715 * x * x * x)))


def _round_up(x, m):
    return (x + m - 1) // m * m


def _row_tile(m, target=512):
    """Row tile: 512 when possible (≈85% of HBM roofline), else padded-M."""
    return target if m >= target else _round_up(m, 8)


def _pad_rows(a, mp):
    m = a.shape[0]
    if m == mp:
        return a
    return jnp.pad(a, ((0, mp - m), (0, 0)))


# ----------------------------- Pallas kernels -------------------------------

def _ln_kernel(x_ref, g_ref, b_ref, o_ref):
    """Plain LayerNorm (embedding LN). f32 math, bf16 output."""
    x = x_ref[...].astype(jnp.float32)
    mu = jnp.mean(x, axis=-1, keepdims=True)
    xc = x - mu
    var = jnp.mean(xc * xc, axis=-1, keepdims=True)
    y = xc * jax.lax.rsqrt(var + LN_EPS)
    o_ref[...] = (y * g_ref[...] + b_ref[...]).astype(o_ref.dtype)


def layernorm(x, gamma, beta):
    M, H = x.shape
    tm = _row_tile(M)
    Mp = _round_up(M, tm)
    xp = _pad_rows(x, Mp)
    out = pl.pallas_call(
        _ln_kernel,
        out_shape=jax.ShapeDtypeStruct((Mp, H), jnp.bfloat16),
        grid=(Mp // tm,),
        in_specs=[
            pl.BlockSpec((tm, H), lambda i: (i, 0)),
            pl.BlockSpec((1, H), lambda i: (0, 0)),
            pl.BlockSpec((1, H), lambda i: (0, 0)),
        ],
        out_specs=pl.BlockSpec((tm, H), lambda i: (i, 0)),
        compiler_params=pltpu.CompilerParams(dimension_semantics=("parallel",)),
    )(xp, gamma.reshape(1, H), beta.reshape(1, H))
    return out[:M] if Mp != M else out


def _attn_kernel(x_ref, wqkv_ref, bqkv_ref, bias_ref, o_ref, *, num_heads, head_dim):
    """Fused QKV projection + multi-head attention for one batch element.

    x: (1,S,H) bf16; wqkv: (H,3H) bf16 (resident); bias: (1,1,S) f32.
    Heads processed in pairs; each pair's context stored directly into a
    2*Dh-wide slice of the lane-dense (1,S,H) output block.
    """
    H = num_heads * head_dim
    x = x_ref[0]                                                   # (S, H) bf16
    qkv = jnp.dot(x, wqkv_ref[...], preferred_element_type=jnp.float32)
    qkv = (qkv + bqkv_ref[...]).astype(jnp.bfloat16)               # (S, 3H), stays in VMEM
    bias = bias_ref[0]                                             # (1, S) f32

    pair = 2 if num_heads % 2 == 0 else 1
    pw = pair * head_dim                                           # 128 lanes at Dh=64
    for hp in range(num_heads // pair):
        lo = hp * pw
        parts = []
        for i in range(pair):                                      # back-to-back MXU pushes
            off = lo + i * head_dim
            q = qkv[:, off:off + head_dim]                         # scale pre-folded into wq
            k = qkv[:, H + off:H + off + head_dim]
            v = qkv[:, 2 * H + off:2 * H + off + head_dim]
            s = jax.lax.dot_general(q, k, (((1,), (1,)), ((), ())),
                                    preferred_element_type=jnp.float32)
            s = s + bias
            m = jnp.max(s, axis=-1, keepdims=True)
            p = jnp.exp((s - m).astype(jnp.bfloat16))              # EUP bf16 fast path
            l = jnp.sum(p.astype(jnp.float32), axis=-1, keepdims=True)
            inv = pl.reciprocal(l, approx=True)
            ctx = jnp.dot(p, v, preferred_element_type=jnp.float32) * inv
            parts.append(ctx)
        slab = parts[0] if pair == 1 else jnp.concatenate(parts, axis=-1)
        o_ref[0, :, lo:lo + pw] = slab.astype(o_ref.dtype)         # pair-aligned store


def self_attention(x, bias, wqkv, bqkv, num_heads, head_dim):
    """x: (B,S,H) bf16; bias: (B,1,S) f32 -> context (B,S,H) bf16."""
    B, S, H = x.shape
    threeH = wqkv.shape[1]
    kernel = functools.partial(_attn_kernel, num_heads=num_heads, head_dim=head_dim)
    return pl.pallas_call(
        kernel,
        out_shape=jax.ShapeDtypeStruct((B, S, H), jnp.bfloat16),
        grid=(B,),
        in_specs=[
            pl.BlockSpec((1, S, H), lambda b: (b, 0, 0)),
            pl.BlockSpec((H, threeH), lambda b: (0, 0)),           # wqkv resident across B
            pl.BlockSpec((1, threeH), lambda b: (0, 0)),
            pl.BlockSpec((1, 1, S), lambda b: (b, 0, 0)),          # no per-head replication
        ],
        out_specs=pl.BlockSpec((1, S, H), lambda b: (b, 0, 0)),
        compiler_params=pltpu.CompilerParams(dimension_semantics=("parallel",)),
    )(x, wqkv, bqkv.reshape(1, threeH), bias)


def _dense_add_ln_kernel(x_ref, w_ref, b_ref, r_ref, g_ref, bb_ref, o_ref):
    """LayerNorm(x @ w + b + residual); bf16 in/out, f32 LN math."""
    y = jnp.dot(x_ref[...], w_ref[...], preferred_element_type=jnp.float32) + b_ref[...]
    y = y + r_ref[...].astype(jnp.float32)
    mu = jnp.mean(y, axis=-1, keepdims=True)
    yc = y - mu
    var = jnp.mean(yc * yc, axis=-1, keepdims=True)
    y = yc * jax.lax.rsqrt(var + LN_EPS)
    o_ref[...] = (y * g_ref[...] + bb_ref[...]).astype(o_ref.dtype)


def dense_add_layernorm(x, w, b, res, gamma, beta):
    """Attention output projection + residual + LayerNorm, fused."""
    M, K = x.shape
    N = w.shape[1]
    tm = _row_tile(M)
    Mp = _round_up(M, tm)
    out = pl.pallas_call(
        _dense_add_ln_kernel,
        out_shape=jax.ShapeDtypeStruct((Mp, N), jnp.bfloat16),
        grid=(Mp // tm,),
        in_specs=[
            pl.BlockSpec((tm, K), lambda i: (i, 0)),
            pl.BlockSpec((K, N), lambda i: (0, 0)),                # weight resident
            pl.BlockSpec((1, N), lambda i: (0, 0)),
            pl.BlockSpec((tm, N), lambda i: (i, 0)),
            pl.BlockSpec((1, N), lambda i: (0, 0)),
            pl.BlockSpec((1, N), lambda i: (0, 0)),
        ],
        out_specs=pl.BlockSpec((tm, N), lambda i: (i, 0)),
        compiler_params=pltpu.CompilerParams(dimension_semantics=("parallel",)),
    )(_pad_rows(x, Mp), w, b.reshape(1, N), _pad_rows(res, Mp),
      gamma.reshape(1, N), beta.reshape(1, N))
    return out[:M] if Mp != M else out


def _ffn_ln_kernel(x_ref, w1_ref, b1_ref, w2_ref, b2_ref, g_ref, bb_ref, o_ref):
    """Fused FFN: LayerNorm(gelu(x@w1+b1) @ w2 + b2 + x).

    The (tm, intermediate) activation never leaves VMEM; residual is the
    kernel's own input tile."""
    x = x_ref[...]                                                 # (tm, H) bf16
    h = jnp.dot(x, w1_ref[...], preferred_element_type=jnp.float32) + b1_ref[...]
    h = _gelu(h).astype(jnp.bfloat16)                              # (tm, I) in VMEM only
    y = jnp.dot(h, w2_ref[...], preferred_element_type=jnp.float32) + b2_ref[...]
    y = y + x.astype(jnp.float32)                                  # residual add
    mu = jnp.mean(y, axis=-1, keepdims=True)
    yc = y - mu
    var = jnp.mean(yc * yc, axis=-1, keepdims=True)
    y = yc * jax.lax.rsqrt(var + LN_EPS)
    o_ref[...] = (y * g_ref[...] + bb_ref[...]).astype(o_ref.dtype)


def ffn_add_layernorm(x, w1, b1, w2, b2, gamma, beta):
    M, H = x.shape
    I = w1.shape[1]
    tm = _row_tile(M)
    Mp = _round_up(M, tm)
    out = pl.pallas_call(
        _ffn_ln_kernel,
        out_shape=jax.ShapeDtypeStruct((Mp, H), jnp.bfloat16),
        grid=(Mp // tm,),
        in_specs=[
            pl.BlockSpec((tm, H), lambda i: (i, 0)),
            pl.BlockSpec((H, I), lambda i: (0, 0)),                # w1 resident
            pl.BlockSpec((1, I), lambda i: (0, 0)),
            pl.BlockSpec((I, H), lambda i: (0, 0)),                # w2 resident
            pl.BlockSpec((1, H), lambda i: (0, 0)),
            pl.BlockSpec((1, H), lambda i: (0, 0)),
            pl.BlockSpec((1, H), lambda i: (0, 0)),
        ],
        out_specs=pl.BlockSpec((tm, H), lambda i: (i, 0)),
        compiler_params=pltpu.CompilerParams(
            dimension_semantics=("parallel",),
            vmem_limit_bytes=48 * 1024 * 1024,                     # headroom for resident w1+w2
        ),
    )(_pad_rows(x, Mp), w1, b1.reshape(1, I), w2, b2.reshape(1, H),
      gamma.reshape(1, H), beta.reshape(1, H))
    return out[:M] if Mp != M else out


# --------------------------- model forward pass ------------------------------

def chat_model_forward(params, input_ids, attention_mask, cfg):
    B, S = input_ids.shape
    H = cfg["hidden_size"]
    nH = cfg["num_heads"]
    Dh = H // nH

    # --- BERT embeddings: word + position + token_type(=0), then LayerNorm ---
    we = params["word_emb"][input_ids]                             # (B,S,H) gather = glue
    pe = params["pos_emb"][:S]                                     # (S,H)
    te = params["type_emb"][0]                                     # (H,)
    x = (we + pe[None, :, :] + te[None, None, :]).astype(jnp.float32).reshape(B * S, H)
    x = layernorm(x, params["emb_ln_g"], params["emb_ln_b"])       # (B*S, H) bf16

    # additive attention bias from the padding mask, kept un-replicated
    bias = ((1.0 - attention_mask.astype(jnp.float32)) * NEG_BIAS).reshape(B, 1, S)

    # --- transformer encoder layers (dropouts are identity at inference) ---
    for lyr in params["layers"]:
        ctx = self_attention(x.reshape(B, S, H), bias,
                             lyr["wqkv"], lyr["bqkv"], nH, Dh)     # (B,S,H) bf16
        x = dense_add_layernorm(ctx.reshape(B * S, H), lyr["wo"], lyr["bo"], x,
                                lyr["ln1_g"], lyr["ln1_b"])        # (B*S,H) bf16
        x = ffn_add_layernorm(x, lyr["w1"], lyr["b1"], lyr["w2"], lyr["b2"],
                              lyr["ln2_g"], lyr["ln2_b"])          # (B*S,H) bf16

    # --- pooler + classifier head: tiny (B,H) matmuls, left to XLA ---
    cls = x.reshape(B, S, H)[:, 0, :].astype(jnp.float32)          # (B, H)
    pooled = jnp.tanh(jnp.dot(cls, params["pool_w"]) + params["pool_b"])
    # nn.Dropout(0.3) is identity at inference time.
    logits = jnp.dot(pooled, params["fc_w"]) + params["fc_b"]      # (B, C)
    return logits


# ------------------------- deterministic parameters ---------------------------

def init_params(key, cfg):
    """PyTorch-layout f32 params (stand-in for the pretrained checkpoint)."""
    H, I = cfg["hidden_size"], cfg["intermediate_size"]
    V, P = cfg["vocab_size"], cfg["max_position"]
    L, C = cfg["num_layers"], cfg["n_classes"]
    std = 0.02
    keys = iter(jax.random.split(key, 8 + 12 * L))

    def nrm(shape):
        return (std * jax.random.normal(next(keys), shape)).astype(jnp.float32)

    params = {
        "word_emb": nrm((V, H)),
        "pos_emb": nrm((P, H)),
        "type_emb": nrm((2, H)),
        "emb_ln_g": jnp.ones((H,), jnp.float32),
        "emb_ln_b": jnp.zeros((H,), jnp.float32),
        "pool_w": nrm((H, H)),
        "pool_b": jnp.zeros((H,), jnp.float32),
        # PyTorch nn.Linear stores weight as (n_classes, H); kept transposed here.
        "fc_w": nrm((H, C)),
        "fc_b": jnp.zeros((C,), jnp.float32),
        "layers": [],
    }
    for _ in range(L):
        params["layers"].append({
            "wq": nrm((H, H)), "bq": jnp.zeros((H,), jnp.float32),
            "wk": nrm((H, H)), "bk": jnp.zeros((H,), jnp.float32),
            "wv": nrm((H, H)), "bv": jnp.zeros((H,), jnp.float32),
            "wo": nrm((H, H)), "bo": jnp.zeros((H,), jnp.float32),
            "ln1_g": jnp.ones((H,), jnp.float32), "ln1_b": jnp.zeros((H,), jnp.float32),
            "w1": nrm((H, I)), "b1": jnp.zeros((I,), jnp.float32),
            "w2": nrm((I, H)), "b2": jnp.zeros((H,), jnp.float32),
            "ln2_g": jnp.ones((H,), jnp.float32), "ln2_b": jnp.zeros((H,), jnp.float32),
        })
    return params


def prepare_params(params, cfg):
    """One-time inference transform: fuse QKV (1/sqrt(Dh) folded into wq/bq) and
    cast encoder matmul weights to bf16.  Embeddings / biases / LN params and the
    tiny pooler/classifier weights (handled by XLA) stay f32."""
    H = cfg["hidden_size"]
    Dh = H // cfg["num_heads"]
    scale = 1.0 / math.sqrt(Dh)
    out = {
        "word_emb": params["word_emb"],
        "pos_emb": params["pos_emb"],
        "type_emb": params["type_emb"],
        "emb_ln_g": params["emb_ln_g"],
        "emb_ln_b": params["emb_ln_b"],
        "pool_w": params["pool_w"],
        "pool_b": params["pool_b"],
        "fc_w": params["fc_w"],
        "fc_b": params["fc_b"],
        "layers": [],
    }
    for lyr in params["layers"]:
        wqkv = jnp.concatenate([lyr["wq"] * scale, lyr["wk"], lyr["wv"]], axis=1)
        bqkv = jnp.concatenate([lyr["bq"] * scale, lyr["bk"], lyr["bv"]], axis=0)
        out["layers"].append({
            "wqkv": wqkv.astype(jnp.bfloat16), "bqkv": bqkv,
            "wo": lyr["wo"].astype(jnp.bfloat16), "bo": lyr["bo"],
            "ln1_g": lyr["ln1_g"], "ln1_b": lyr["ln1_b"],
            "w1": lyr["w1"].astype(jnp.bfloat16), "b1": lyr["b1"],
            "w2": lyr["w2"].astype(jnp.bfloat16), "b2": lyr["b2"],
            "ln2_g": lyr["ln2_g"], "ln2_b": lyr["ln2_b"],
        })
    return out


if __name__ == "__main__":
    # Tiny BERT-style config (stand-in for bert-base-uncased) + n_classes head.
    cfg = dict(hidden_size=32, num_heads=4, num_layers=2, intermediate_size=64,
               vocab_size=100, max_position=16, n_classes=3)

    key = jax.random.PRNGKey(0)
    pkey, ikey = jax.random.split(key)
    params = prepare_params(init_params(pkey, cfg), cfg)

    B, S = 2, 8
    input_ids = jax.random.randint(ikey, (B, S), 0, cfg["vocab_size"], dtype=jnp.int32)
    attention_mask = jnp.ones((B, S), dtype=jnp.int32).at[1, 6:].set(0)  # padded example

    fwd = jax.jit(functools.partial(chat_model_forward, cfg=cfg))
    logits = fwd(params, input_ids, attention_mask)
    jax.block_until_ready(logits)
    assert logits.shape == (B, cfg["n_classes"]) and logits.dtype == jnp.float32
    print("KERNEL_OK")
</pallas_src>

<mosaic_0001>
module attributes {stable_mosaic.version = 11 : i64} {
  func.func @_attn_kernel(%arg0: i32, %arg1: memref<1x8x32xbf16, #tpu.memory_space<vmem>>, %arg2: memref<32x96xbf16, #tpu.memory_space<vmem>>, %arg3: memref<1x96xf32, #tpu.memory_space<vmem>>, %arg4: memref<1x1x8xf32, #tpu.memory_space<vmem>>, %arg5: memref<1x8x32xbf16, #tpu.memory_space<vmem>>) attributes {dimension_semantics = [#tpu.dimension_semantics<parallel>], iteration_bounds = array<i64: 2>, scalar_prefetch = 0 : i64, scratch_operands = 0 : i64, tpu.core_type = #tpu.core_type<tc>, window_params = [{transform_indices = @transform_0, window_bounds = array<i64: 1, 8, 32>}, {pipeline_mode = #tpu.pipeline_mode<synchronous>, transform_indices = @transform_1, window_bounds = array<i64: 32, 96>}, {pipeline_mode = #tpu.pipeline_mode<synchronous>, transform_indices = @transform_2, window_bounds = array<i64: 1, 96>}, {transform_indices = @transform_3, window_bounds = array<i64: 1, 1, 8>}, {transform_indices = @transform_4, window_bounds = array<i64: 1, 8, 32>}]} {
    %c0 = arith.constant 0 : index
    %c0_0 = arith.constant 0 : index
    %c0_1 = arith.constant 0 : index
    %0 = vector.load %arg1[%c0, %c0_0, %c0_1] : memref<1x8x32xbf16, #tpu.memory_space<vmem>>, vector<1x8x32xbf16>
    %1 = vector.shape_cast %0 : vector<1x8x32xbf16> to vector<8x32xbf16>
    %c0_2 = arith.constant 0 : index
    %c0_3 = arith.constant 0 : index
    %2 = vector.load %arg2[%c0_2, %c0_3] : memref<32x96xbf16, #tpu.memory_space<vmem>>, vector<32x96xbf16>
    %cst = arith.constant dense<0.000000e+00> : vector<8x96xf32>
    %3 = tpu.matmul %1, %2, %cst {dimension_numbers = #tpu.dot_dimension_numbers<[1], [0], [0], [1], [0, 0, 1, 1], [], []>} : vector<8x32xbf16>, vector<32x96xbf16>, vector<8x96xf32> -> vector<8x96xf32>
    %c0_4 = arith.constant 0 : index
    %c0_5 = arith.constant 0 : index
    %4 = vector.load %arg3[%c0_4, %c0_5] : memref<1x96xf32, #tpu.memory_space<vmem>>, vector<1x96xf32>
    %5 = vector.broadcast %4 : vector<1x96xf32> to vector<8x96xf32>
    %6 = arith.addf %3, %5 : vector<8x96xf32>
    %7 = arith.truncf %6 : vector<8x96xf32> to vector<8x96xbf16>
    %c0_6 = arith.constant 0 : index
    %c0_7 = arith.constant 0 : index
    %c0_8 = arith.constant 0 : index
    %8 = vector.load %arg4[%c0_6, %c0_7, %c0_8] : memref<1x1x8xf32, #tpu.memory_space<vmem>>, vector<1x1x8xf32>
    %9 = vector.shape_cast %8 : vector<1x1x8xf32> to vector<1x8xf32>
    %10 = vector.extract_strided_slice %7 {offsets = [0, 0], sizes = [8, 8], strides = [1, 1]} : vector<8x96xbf16> to vector<8x8xbf16>
    %11 = vector.extract_strided_slice %7 {offsets = [0, 32], sizes = [8, 8], strides = [1, 1]} : vector<8x96xbf16> to vector<8x8xbf16>
    %12 = vector.extract_strided_slice %7 {offsets = [0, 64], sizes = [8, 8], strides = [1, 1]} : vector<8x96xbf16> to vector<8x8xbf16>
    %cst_9 = arith.constant dense<0.000000e+00> : vector<8x8xf32>
    %13 = tpu.matmul %10, %11, %cst_9 {dimension_numbers = #tpu.dot_dimension_numbers<[1], [1], [0], [0], [0, 0, 1, 0], [], []>} : vector<8x8xbf16>, vector<8x8xbf16>, vector<8x8xf32> -> vector<8x8xf32>
    %14 = vector.broadcast %9 : vector<1x8xf32> to vector<8x8xf32>
    %15 = arith.addf %13, %14 : vector<8x8xf32>
    %cst_10 = arith.constant dense<0xFF800000> : vector<8xf32>
    %16 = vector.multi_reduction <maximumf>, %15, %cst_10 [1] : vector<8x8xf32> to vector<8xf32>
    %17 = vector.shape_cast %16 : vector<8xf32> to vector<8x1xf32>
    %18 = vector.broadcast %17 : vector<8x1xf32> to vector<8x8xf32>
    %19 = arith.subf %15, %18 : vector<8x8xf32>
    %20 = arith.truncf %19 : vector<8x8xf32> to vector<8x8xbf16>
    %21 = math.exp %20 : vector<8x8xbf16>
    %22 = arith.extf %21 : vector<8x8xbf16> to vector<8x8xf32>
    %cst_11 = arith.constant dense<0.000000e+00> : vector<8xf32>
    %23 = vector.multi_reduction <add>, %22, %cst_11 [1] : vector<8x8xf32> to vector<8xf32>
    %24 = vector.shape_cast %23 : vector<8xf32> to vector<8x1xf32>
    %25 = tpu.reciprocal %24 {approx = true} : vector<8x1xf32> -> vector<8x1xf32>
    %cst_12 = arith.constant dense<0.000000e+00> : vector<8x8xf32>
    %26 = tpu.matmul %21, %12, %cst_12 {dimension_numbers = #tpu.dot_dimension_numbers<[1], [0], [0], [1], [0, 0, 1, 1], [], []>} : vector<8x8xbf16>, vector<8x8xbf16>, vector<8x8xf32> -> vector<8x8xf32>
    %27 = vector.broadcast %25 : vector<8x1xf32> to vector<8x8xf32>
    %28 = arith.mulf %26, %27 : vector<8x8xf32>
    %29 = vector.extract_strided_slice %7 {offsets = [0, 8], sizes = [8, 8], strides = [1, 1]} : vector<8x96xbf16> to vector<8x8xbf16>
    %30 = vector.extract_strided_slice %7 {offsets = [0, 40], sizes = [8, 8], strides = [1, 1]} : vector<8x96xbf16> to vector<8x8xbf16>
    %31 = vector.extract_strided_slice %7 {offsets = [0, 72], sizes = [8, 8], strides = [1, 1]} : vector<8x96xbf16> to vector<8x8xbf16>
    %cst_13 = arith.constant dense<0.000000e+00> : vector<8x8xf32>
    %32 = tpu.matmul %29, %30, %cst_13 {dimension_numbers = #tpu.dot_dimension_numbers<[1], [1], [0], [0], [0, 0, 1, 0], [], []>} : vector<8x8xbf16>, vector<8x8xbf16>, vector<8x8xf32> -> vector<8x8xf32>
    %33 = vector.broadcast %9 : vector<1x8xf32> to vector<8x8xf32>
    %34 = arith.addf %32, %33 : vector<8x8xf32>
    %cst_14 = arith.constant dense<0xFF800000> : vector<8xf32>
    %35 = vector.multi_reduction <maximumf>, %34, %cst_14 [1] : vector<8x8xf32> to vector<8xf32>
    %36 = vector.shape_cast %35 : vector<8xf32> to vector<8x1xf32>
    %37 = vector.broadcast %36 : vector<8x1xf32> to vector<8x8xf32>
    %38 = arith.subf %34, %37 : vector<8x8xf32>
    %39 = arith.truncf %38 : vector<8x8xf32> to vector<8x8xbf16>
    %40 = math.exp %39 : vector<8x8xbf16>
    %41 = arith.extf %40 : vector<8x8xbf16> to vector<8x8xf32>
    %cst_15 = arith.constant dense<0.000000e+00> : vector<8xf32>
    %42 = vector.multi_reduction <add>, %41, %cst_15 [1] : vector<8x8xf32> to vector<8xf32>
    %43 = vector.shape_cast %42 : vector<8xf32> to vector<8x1xf32>
    %44 = tpu.reciprocal %43 {approx = true} : vector<8x1xf32> -> vector<8x1xf32>
    %cst_16 = arith.constant dense<0.000000e+00> : vector<8x8xf32>
    %45 = tpu.matmul %40, %31, %cst_16 {dimension_numbers = #tpu.dot_dimension_numbers<[1], [0], [0], [1], [0, 0, 1, 1], [], []>} : vector<8x8xbf16>, vector<8x8xbf16>, vector<8x8xf32> -> vector<8x8xf32>
    %46 = vector.broadcast %44 : vector<8x1xf32> to vector<8x8xf32>
    %47 = arith.mulf %45, %46 : vector<8x8xf32>
    %48 = tpu.concatenate %28, %47 in 1 : vector<8x8xf32>, vector<8x8xf32> -> vector<8x16xf32>
    %49 = arith.truncf %48 : vector<8x16xf32> to vector<8x16xbf16>
    %c0_17 = arith.constant 0 : index
    %c0_18 = arith.constant 0 : index
    %c0_19 = arith.constant 0 : index
    %50 = vector.load %arg5[%c0_17, %c0_18, %c0_19] : memref<1x8x32xbf16, #tpu.memory_space<vmem>>, vector<1x8x16xbf16>
    %51 = vector.shape_cast %50 : vector<1x8x16xbf16> to vector<8x16xbf16>
    %52 = vector.shape_cast %49 : vector<8x16xbf16> to vector<1x8x16xbf16>
    tpu.vector_store %arg5[%c0_17, %c0_18, %c0_19], %52 {strides = array<i32>} : memref<1x8x32xbf16, #tpu.memory_space<vmem>>, vector<1x8x16xbf16>,
    %53 = vector.extract_strided_slice %7 {offsets = [0, 16], sizes = [8, 8], strides = [1, 1]} : vector<8x96xbf16> to vector<8x8xbf16>
    %54 = vector.extract_strided_slice %7 {offsets = [0, 48], sizes = [8, 8], strides = [1, 1]} : vector<8x96xbf16> to vector<8x8xbf16>
    %55 = vector.extract_strided_slice %7 {offsets = [0, 80], sizes = [8, 8], strides = [1, 1]} : vector<8x96xbf16> to vector<8x8xbf16>
    %cst_20 = arith.constant dense<0.000000e+00> : vector<8x8xf32>
    %56 = tpu.matmul %53, %54, %cst_20 {dimension_numbers = #tpu.dot_dimension_numbers<[1], [1], [0], [0], [0, 0, 1, 0], [], []>} : vector<8x8xbf16>, vector<8x8xbf16>, vector<8x8xf32> -> vector<8x8xf32>
    %57 = vector.broadcast %9 : vector<1x8xf32> to vector<8x8xf32>
    %58 = arith.addf %56, %57 : vector<8x8xf32>
    %cst_21 = arith.constant dense<0xFF800000> : vector<8xf32>
    %59 = vector.multi_reduction <maximumf>, %58, %cst_21 [1] : vector<8x8xf32> to vector<8xf32>
    %60 = vector.shape_cast %59 : vector<8xf32> to vector<8x1xf32>
    %61 = vector.broadcast %60 : vector<8x1xf32> to vector<8x8xf32>
    %62 = arith.subf %58, %61 : vector<8x8xf32>
    %63 = arith.truncf %62 : vector<8x8xf32> to vector<8x8xbf16>
    %64 = math.exp %63 : vector<8x8xbf16>
    %65 = arith.extf %64 : vector<8x8xbf16> to vector<8x8xf32>
    %cst_22 = arith.constant dense<0.000000e+00> : vector<8xf32>
    %66 = vector.multi_reduction <add>, %65, %cst_22 [1] : vector<8x8xf32> to vector<8xf32>
    %67 = vector.shape_cast %66 : vector<8xf32> to vector<8x1xf32>
    %68 = tpu.reciprocal %67 {approx = true} : vector<8x1xf32> -> vector<8x1xf32>
    %cst_23 = arith.constant dense<0.000000e+00> : vector<8x8xf32>
    %69 = tpu.matmul %64, %55, %cst_23 {dimension_numbers = #tpu.dot_dimension_numbers<[1], [0], [0], [1], [0, 0, 1, 1], [], []>} : vector<8x8xbf16>, vector<8x8xbf16>, vector<8x8xf32> -> vector<8x8xf32>
    %70 = vector.broadcast %68 : vector<8x1xf32> to vector<8x8xf32>
    %71 = arith.mulf %69, %70 : vector<8x8xf32>
    %72 = vector.extract_strided_slice %7 {offsets = [0, 24], sizes = [8, 8], strides = [1, 1]} : vector<8x96xbf16> to vector<8x8xbf16>
    %73 = vector.extract_strided_slice %7 {offsets = [0, 56], sizes = [8, 8], strides = [1, 1]} : vector<8x96xbf16> to vector<8x8xbf16>
    %74 = vector.extract_strided_slice %7 {offsets = [0, 88], sizes = [8, 8], strides = [1, 1]} : vector<8x96xbf16> to vector<8x8xbf16>
    %cst_24 = arith.constant dense<0.000000e+00> : vector<8x8xf32>
    %75 = tpu.matmul %72, %73, %cst_24 {dimension_numbers = #tpu.dot_dimension_numbers<[1], [1], [0], [0], [0, 0, 1, 0], [], []>} : vector<8x8xbf16>, vector<8x8xbf16>, vector<8x8xf32> -> vector<8x8xf32>
    %76 = vector.broadcast %9 : vector<1x8xf32> to vector<8x8xf32>
    %77 = arith.addf %75, %76 : vector<8x8xf32>
    %cst_25 = arith.constant dense<0xFF800000> : vector<8xf32>
    %78 = vector.multi_reduction <maximumf>, %77, %cst_25 [1] : vector<8x8xf32> to vector<8xf32>
    %79 = vector.shape_cast %78 : vector<8xf32> to vector<8x1xf32>
    %80 = vector.broadcast %79 : vector<8x1xf32> to vector<8x8xf32>
    %81 = arith.subf %77, %80 : vector<8x8xf32>
    %82 = arith.truncf %81 : vector<8x8xf32> to vector<8x8xbf16>
    %83 = math.exp %82 : vector<8x8xbf16>
    %84 = arith.extf %83 : vector<8x8xbf16> to vector<8x8xf32>
    %cst_26 = arith.constant dense<0.000000e+00> : vector<8xf32>
    %85 = vector.multi_reduction <add>, %84, %cst_26 [1] : vector<8x8xf32> to vector<8xf32>
    %86 = vector.shape_cast %85 : vector<8xf32> to vector<8x1xf32>
    %87 = tpu.reciprocal %86 {approx = true} : vector<8x1xf32> -> vector<8x1xf32>
    %cst_27 = arith.constant dense<0.000000e+00> : vector<8x8xf32>
    %88 = tpu.matmul %83, %74, %cst_27 {dimension_numbers = #tpu.dot_dimension_numbers<[1], [0], [0], [1], [0, 0, 1, 1], [], []>} : vector<8x8xbf16>, vector<8x8xbf16>, vector<8x8xf32> -> vector<8x8xf32>
    %89 = vector.broadcast %87 : vector<8x1xf32> to vector<8x8xf32>
    %90 = arith.mulf %88, %89 : vector<8x8xf32>
    %91 = tpu.concatenate %71, %90 in 1 : vector<8x8xf32>, vector<8x8xf32> -> vector<8x16xf32>
    %92 = arith.truncf %91 : vector<8x16xf32> to vector<8x16xbf16>
    %c0_28 = arith.constant 0 : index
    %c0_29 = arith.constant 0 : index
    %c16 = arith.constant 16 : index
    %93 = vector.load %arg5[%c0_28, %c0_29, %c16] : memref<1x8x32xbf16, #tpu.memory_space<vmem>>, vector<1x8x16xbf16>
    %94 = vector.shape_cast %93 : vector<1x8x16xbf16> to vector<8x16xbf16>
    %95 = vector.shape_cast %92 : vector<8x16xbf16> to vector<1x8x16xbf16>
    tpu.vector_store %arg5[%c0_28, %c0_29, %c16], %95 {strides = array<i32>} : memref<1x8x32xbf16, #tpu.memory_space<vmem>>, vector<1x8x16xbf16>,
    return
  }
  func.func @transform_0(%arg0: i32) -> (i32, i32, i32) {
    %c0_i32 = arith.constant 0 : i32
    %c0_i32_0 = arith.constant 0 : i32
    %c0_i32_1 = arith.constant 0 : i32
    return %arg0, %c0_i32, %c0_i32_0 : i32, i32, i32
  }
  func.func @transform_1(%arg0: i32) -> (i32, i32) {
    %c0_i32 = arith.constant 0 : i32
    %c0_i32_0 = arith.constant 0 : i32
    %c0_i32_1 = arith.constant 0 : i32
    return %c0_i32, %c0_i32_0 : i32, i32
  }
  func.func @transform_2(%arg0: i32) -> (i32, i32) {
    %c0_i32 = arith.constant 0 : i32
    %c0_i32_0 = arith.constant 0 : i32
    %c0_i32_1 = arith.constant 0 : i32
    return %c0_i32, %c0_i32_0 : i32, i32
  }
  func.func @transform_3(%arg0: i32) -> (i32, i32, i32) {
    %c0_i32 = arith.constant 0 : i32
    %c0_i32_0 = arith.constant 0 : i32
    %c0_i32_1 = arith.constant 0 : i32
    return %arg0, %c0_i32, %c0_i32_0 : i32, i32, i32
  }
  func.func @transform_4(%arg0: i32) -> (i32, i32, i32) {
    %c0_i32 = arith.constant 0 : i32
    %c0_i32_0 = arith.constant 0 : i32
    %c0_i32_1 = arith.constant 0 : i32
    return %arg0, %c0_i32, %c0_i32_0 : i32, i32, i32
  }
}

module attributes {stable_mosaic.version = 11 : i64} {
  func.func @_ln_kernel(%arg0: i32, %arg1: memref<16x32xf32, #tpu.memory_space<vmem>>, %arg2: memref<1x32xf32, #tpu.memory_space<vmem>>, %arg3: memref<1x32xf32, #tpu.memory_space<vmem>>, %arg4: memref<16x32xbf16, #tpu.memory_space<vmem>>) attributes {dimension_semantics = [#tpu.dimension_semantics<parallel>], iteration_bounds = array<i64: 1>, scalar_prefetch = 0 : i64, scratch_operands = 0 : i64, tpu.core_type = #tpu.core_type<tc>, window_params = [{transform_indices = @transform_0, window_bounds = array<i64: 16, 32>}, {pipeline_mode = #tpu.pipeline_mode<synchronous>, transform_indices = @transform_1, window_bounds = array<i64: 1, 32>}, {pipeline_mode = #tpu.pipeline_mode<synchronous>, transform_indices = @transform_2, window_bounds = array<i64: 1, 32>}, {transform_indices = @transform_3, window_bounds = array<i64: 16, 32>}]} {
    %c0 = arith.constant 0 : index
    %c0_0 = arith.constant 0 : index
    %0 = vector.load %arg1[%c0, %c0_0] : memref<16x32xf32, #tpu.memory_space<vmem>>, vector<16x32xf32>
    %cst = arith.constant dense<0.000000e+00> : vector<16xf32>
    %1 = vector.multi_reduction <add>, %0, %cst [1] : vector<16x32xf32> to vector<16xf32>
    %2 = vector.shape_cast %1 : vector<16xf32> to vector<16x1xf32>
    %cst_1 = arith.constant 3.200000e+01 : f32
    %3 = vector.broadcast %cst_1 : f32 to vector<16x1xf32>
    %4 = arith.divf %2, %3 : vector<16x1xf32>
    %5 = vector.broadcast %4 : vector<16x1xf32> to vector<16x32xf32>
    %6 = arith.subf %0, %5 : vector<16x32xf32>
    %7 = arith.mulf %6, %6 : vector<16x32xf32>
    %cst_2 = arith.constant dense<0.000000e+00> : vector<16xf32>
    %8 = vector.multi_reduction <add>, %7, %cst_2 [1] : vector<16x32xf32> to vector<16xf32>
    %9 = vector.shape_cast %8 : vector<16xf32> to vector<16x1xf32>
    %cst_3 = arith.constant 3.200000e+01 : f32
    %10 = vector.broadcast %cst_3 : f32 to vector<16x1xf32>
    %11 = arith.divf %9, %10 : vector<16x1xf32>
    %cst_4 = arith.constant 9.99999996E-13 : f32
    %12 = vector.broadcast %cst_4 : f32 to vector<16x1xf32>
    %13 = arith.addf %11, %12 : vector<16x1xf32>
    %14 = math.rsqrt %13 : vector<16x1xf32>
    %15 = vector.broadcast %14 : vector<16x1xf32> to vector<16x32xf32>
    %16 = arith.mulf %6, %15 : vector<16x32xf32>
    %c0_5 = arith.constant 0 : index
    %c0_6 = arith.constant 0 : index
    %17 = vector.load %arg2[%c0_5, %c0_6] : memref<1x32xf32, #tpu.memory_space<vmem>>, vector<1x32xf32>
    %18 = vector.broadcast %17 : vector<1x32xf32> to vector<16x32xf32>
    %19 = arith.mulf %16, %18 : vector<16x32xf32>
    %c0_7 = arith.constant 0 : index
    %c0_8 = arith.constant 0 : index
    %20 = vector.load %arg3[%c0_7, %c0_8] : memref<1x32xf32, #tpu.memory_space<vmem>>, vector<1x32xf32>
    %21 = vector.broadcast %20 : vector<1x32xf32> to vector<16x32xf32>
    %22 = arith.addf %19, %21 : vector<16x32xf32>
    %23 = arith.truncf %22 : vector<16x32xf32> to vector<16x32xbf16>
    %c0_9 = arith.constant 0 : index
    %c0_10 = arith.constant 0 : index
    %24 = vector.load %arg4[%c0_9, %c0_10] : memref<16x32xbf16, #tpu.memory_space<vmem>>, vector<16x32xbf16>
    tpu.vector_store %arg4[%c0_9, %c0_10], %23 {strides = array<i32>} : memref<16x32xbf16, #tpu.memory_space<vmem>>, vector<16x32xbf16>,
    return
  }
  func.func @transform_0(%arg0: i32) -> (i32, i32) {
    %c0_i32 = arith.constant 0 : i32
    %c0_i32_0 = arith.constant 0 : i32
    return %arg0, %c0_i32 : i32, i32
  }
  func.func @transform_1(%arg0: i32) -> (i32, i32) {
    %c0_i32 = arith.constant 0 : i32
    %c0_i32_0 = arith.constant 0 : i32
    %c0_i32_1 = arith.constant 0 : i32
    return %c0_i32, %c0_i32_0 : i32, i32
  }
  func.func @transform_2(%arg0: i32) -> (i32, i32) {
    %c0_i32 = arith.constant 0 : i32
    %c0_i32_0 = arith.constant 0 : i32
    %c0_i32_1 = arith.constant 0 : i32
    return %c0_i32, %c0_i32_0 : i32, i32
  }
  func.func @transform_3(%arg0: i32) -> (i32, i32) {
    %c0_i32 = arith.constant 0 : i32
    %c0_i32_0 = arith.constant 0 : i32
    return %arg0, %c0_i32 : i32, i32
  }
}

module attributes {stable_mosaic.version = 11 : i64} {
  func.func @_dense_add_ln_kernel(%arg0: i32, %arg1: memref<16x32xbf16, #tpu.memory_space<vmem>>, %arg2: memref<32x32xbf16, #tpu.memory_space<vmem>>, %arg3: memref<1x32xf32, #tpu.memory_space<vmem>>, %arg4: memref<16x32xbf16, #tpu.memory_space<vmem>>, %arg5: memref<1x32xf32, #tpu.memory_space<vmem>>, %arg6: memref<1x32xf32, #tpu.memory_space<vmem>>, %arg7: memref<16x32xbf16, #tpu.memory_space<vmem>>) attributes {dimension_semantics = [#tpu.dimension_semantics<parallel>], iteration_bounds = array<i64: 1>, scalar_prefetch = 0 : i64, scratch_operands = 0 : i64, tpu.core_type = #tpu.core_type<tc>, window_params = [{transform_indices = @transform_0, window_bounds = array<i64: 16, 32>}, {pipeline_mode = #tpu.pipeline_mode<synchronous>, transform_indices = @transform_1, window_bounds = array<i64: 32, 32>}, {pipeline_mode = #tpu.pipeline_mode<synchronous>, transform_indices = @transform_2, window_bounds = array<i64: 1, 32>}, {transform_indices = @transform_3, window_bounds = array<i64: 16, 32>}, {pipeline_mode = #tpu.pipeline_mode<synchronous>, transform_indices = @transform_4, window_bounds = array<i64: 1, 32>}, {pipeline_mode = #tpu.pipeline_mode<synchronous>, transform_indices = @transform_5, window_bounds = array<i64: 1, 32>}, {transform_indices = @transform_6, window_bounds = array<i64: 16, 32>}]} {
    %c0 = arith.constant 0 : index
    %c0_0 = arith.constant 0 : index
    %0 = vector.load %arg1[%c0, %c0_0] : memref<16x32xbf16, #tpu.memory_space<vmem>>, vector<16x32xbf16>
    %c0_1 = arith.constant 0 : index
    %c0_2 = arith.constant 0 : index
    %1 = vector.load %arg2[%c0_1, %c0_2] : memref<32x32xbf16, #tpu.memory_space<vmem>>, vector<32x32xbf16>
    %cst = arith.constant dense<0.000000e+00> : vector<16x32xf32>
    %2 = tpu.matmul %0, %1, %cst {dimension_numbers = #tpu.dot_dimension_numbers<[1], [0], [0], [1], [0, 0, 1, 1], [], []>} : vector<16x32xbf16>, vector<32x32xbf16>, vector<16x32xf32> -> vector<16x32xf32>
    %c0_3 = arith.constant 0 : index
    %c0_4 = arith.constant 0 : index
    %3 = vector.load %arg3[%c0_3, %c0_4] : memref<1x32xf32, #tpu.memory_space<vmem>>, vector<1x32xf32>
    %4 = vector.broadcast %3 : vector<1x32xf32> to vector<16x32xf32>
    %5 = arith.addf %2, %4 : vector<16x32xf32>
    %c0_5 = arith.constant 0 : index
    %c0_6 = arith.constant 0 : index
    %6 = vector.load %arg4[%c0_5, %c0_6] : memref<16x32xbf16, #tpu.memory_space<vmem>>, vector<16x32xbf16>
    %7 = arith.extf %6 : vector<16x32xbf16> to vector<16x32xf32>
    %8 = arith.addf %5, %7 : vector<16x32xf32>
    %cst_7 = arith.constant dense<0.000000e+00> : vector<16xf32>
    %9 = vector.multi_reduction <add>, %8, %cst_7 [1] : vector<16x32xf32> to vector<16xf32>
    %10 = vector.shape_cast %9 : vector<16xf32> to vector<16x1xf32>
    %cst_8 = arith.constant 3.200000e+01 : f32
    %11 = vector.broadcast %cst_8 : f32 to vector<16x1xf32>
    %12 = arith.divf %10, %11 : vector<16x1xf32>
    %13 = vector.broadcast %12 : vector<16x1xf32> to vector<16x32xf32>
    %14 = arith.subf %8, %13 : vector<16x32xf32>
    %15 = arith.mulf %14, %14 : vector<16x32xf32>
    %cst_9 = arith.constant dense<0.000000e+00> : vector<16xf32>
    %16 = vector.multi_reduction <add>, %15, %cst_9 [1] : vector<16x32xf32> to vector<16xf32>
    %17 = vector.shape_cast %16 : vector<16xf32> to vector<16x1xf32>
    %cst_10 = arith.constant 3.200000e+01 : f32
    %18 = vector.broadcast %cst_10 : f32 to vector<16x1xf32>
    %19 = arith.divf %17, %18 : vector<16x1xf32>
    %cst_11 = arith.constant 9.99999996E-13 : f32
    %20 = vector.broadcast %cst_11 : f32 to vector<16x1xf32>
    %21 = arith.addf %19, %20 : vector<16x1xf32>
    %22 = math.rsqrt %21 : vector<16x1xf32>
    %23 = vector.broadcast %22 : vector<16x1xf32> to vector<16x32xf32>
    %24 = arith.mulf %14, %23 : vector<16x32xf32>
    %c0_12 = arith.constant 0 : index
    %c0_13 = arith.constant 0 : index
    %25 = vector.load %arg5[%c0_12, %c0_13] : memref<1x32xf32, #tpu.memory_space<vmem>>, vector<1x32xf32>
    %26 = vector.broadcast %25 : vector<1x32xf32> to vector<16x32xf32>
    %27 = arith.mulf %24, %26 : vector<16x32xf32>
    %c0_14 = arith.constant 0 : index
    %c0_15 = arith.constant 0 : index
    %28 = vector.load %arg6[%c0_14, %c0_15] : memref<1x32xf32, #tpu.memory_space<vmem>>, vector<1x32xf32>
    %29 = vector.broadcast %28 : vector<1x32xf32> to vector<16x32xf32>
    %30 = arith.addf %27, %29 : vector<16x32xf32>
    %31 = arith.truncf %30 : vector<16x32xf32> to vector<16x32xbf16>
    %c0_16 = arith.constant 0 : index
    %c0_17 = arith.constant 0 : index
    %32 = vector.load %arg7[%c0_16, %c0_17] : memref<16x32xbf16, #tpu.memory_space<vmem>>, vector<16x32xbf16>
    tpu.vector_store %arg7[%c0_16, %c0_17], %31 {strides = array<i32>} : memref<16x32xbf16, #tpu.memory_space<vmem>>, vector<16x32xbf16>,
    return
  }
  func.func @transform_0(%arg0: i32) -> (i32, i32) {
    %c0_i32 = arith.constant 0 : i32
    %c0_i32_0 = arith.constant 0 : i32
    return %arg0, %c0_i32 : i32, i32
  }
  func.func @transform_1(%arg0: i32) -> (i32, i32) {
    %c0_i32 = arith.constant 0 : i32
    %c0_i32_0 = arith.constant 0 : i32
    %c0_i32_1 = arith.constant 0 : i32
    return %c0_i32, %c0_i32_0 : i32, i32
  }
  func.func @transform_2(%arg0: i32) -> (i32, i32) {
    %c0_i32 = arith.constant 0 : i32
    %c0_i32_0 = arith.constant 0 : i32
    %c0_i32_1 = arith.constant 0 : i32
    return %c0_i32, %c0_i32_0 : i32, i32
  }
  func.func @transform_3(%arg0: i32) -> (i32, i32) {
    %c0_i32 = arith.constant 0 : i32
    %c0_i32_0 = arith.constant 0 : i32
    return %arg0, %c0_i32 : i32, i32
  }
  func.func @transform_4(%arg0: i32) -> (i32, i32) {
    %c0_i32 = arith.constant 0 : i32
    %c0_i32_0 = arith.constant 0 : i32
    %c0_i32_1 = arith.constant 0 : i32
    return %c0_i32, %c0_i32_0 : i32, i32
  }
  func.func @transform_5(%arg0: i32) -> (i32, i32) {
    %c0_i32 = arith.constant 0 : i32
    %c0_i32_0 = arith.constant 0 : i32
    %c0_i32_1 = arith.constant 0 : i32
    return %c0_i32, %c0_i32_0 : i32, i32
  }
  func.func @transform_6(%arg0: i32) -> (i32, i32) {
    %c0_i32 = arith.constant 0 : i32
    %c0_i32_0 = arith.constant 0 : i32
    return %arg0, %c0_i32 : i32, i32
  }
}

module attributes {stable_mosaic.version = 11 : i64} {
  func.func @_ffn_ln_kernel(%arg0: i32, %arg1: memref<16x32xbf16, #tpu.memory_space<vmem>>, %arg2: memref<32x64xbf16, #tpu.memory_space<vmem>>, %arg3: memref<1x64xf32, #tpu.memory_space<vmem>>, %arg4: memref<64x32xbf16, #tpu.memory_space<vmem>>, %arg5: memref<1x32xf32, #tpu.memory_space<vmem>>, %arg6: memref<1x32xf32, #tpu.memory_space<vmem>>, %arg7: memref<1x32xf32, #tpu.memory_space<vmem>>, %arg8: memref<16x32xbf16, #tpu.memory_space<vmem>>) attributes {dimension_semantics = [#tpu.dimension_semantics<parallel>], iteration_bounds = array<i64: 1>, scalar_prefetch = 0 : i64, scratch_operands = 0 : i64, tpu.core_type = #tpu.core_type<tc>, window_params = [{transform_indices = @transform_0, window_bounds = array<i64: 16, 32>}, {pipeline_mode = #tpu.pipeline_mode<synchronous>, transform_indices = @transform_1, window_bounds = array<i64: 32, 64>}, {pipeline_mode = #tpu.pipeline_mode<synchronous>, transform_indices = @transform_2, window_bounds = array<i64: 1, 64>}, {pipeline_mode = #tpu.pipeline_mode<synchronous>, transform_indices = @transform_3, window_bounds = array<i64: 64, 32>}, {pipeline_mode = #tpu.pipeline_mode<synchronous>, transform_indices = @transform_4, window_bounds = array<i64: 1, 32>}, {pipeline_mode = #tpu.pipeline_mode<synchronous>, transform_indices = @transform_5, window_bounds = array<i64: 1, 32>}, {pipeline_mode = #tpu.pipeline_mode<synchronous>, transform_indices = @transform_6, window_bounds = array<i64: 1, 32>}, {transform_indices = @transform_7, window_bounds = array<i64: 16, 32>}]} {
    %c0 = arith.constant 0 : index
    %c0_0 = arith.constant 0 : index
    %0 = vector.load %arg1[%c0, %c0_0] : memref<16x32xbf16, #tpu.memory_space<vmem>>, vector<16x32xbf16>
    %c0_1 = arith.constant 0 : index
    %c0_2 = arith.constant 0 : index
    %1 = vector.load %arg2[%c0_1, %c0_2] : memref<32x64xbf16, #tpu.memory_space<vmem>>, vector<32x64xbf16>
    %cst = arith.constant dense<0.000000e+00> : vector<16x64xf32>
    %2 = tpu.matmul %0, %1, %cst {dimension_numbers = #tpu.dot_dimension_numbers<[1], [0], [0], [1], [0, 0, 1, 1], [], []>} : vector<16x32xbf16>, vector<32x64xbf16>, vector<16x64xf32> -> vector<16x64xf32>
    %c0_3 = arith.constant 0 : index
    %c0_4 = arith.constant 0 : index
    %3 = vector.load %arg3[%c0_3, %c0_4] : memref<1x64xf32, #tpu.memory_space<vmem>>, vector<1x64xf32>
    %4 = vector.broadcast %3 : vector<1x64xf32> to vector<16x64xf32>
    %5 = arith.addf %2, %4 : vector<16x64xf32>
    %cst_5 = arith.constant 5.000000e-01 : f32
    %6 = vector.broadcast %cst_5 : f32 to vector<16x64xf32>
    %7 = arith.mulf %6, %5 : vector<16x64xf32>
    %cst_6 = arith.constant 4.471500e-02 : f32
    %8 = vector.broadcast %cst_6 : f32 to vector<16x64xf32>
    %9 = arith.mulf %8, %5 : vector<16x64xf32>
    %10 = arith.mulf %9, %5 : vector<16x64xf32>
    %11 = arith.mulf %10, %5 : vector<16x64xf32>
    %12 = arith.addf %5, %11 : vector<16x64xf32>
    %cst_7 = arith.constant 0.797884583 : f32
    %13 = vector.broadcast %cst_7 : f32 to vector<16x64xf32>
    %14 = arith.mulf %13, %12 : vector<16x64xf32>
    %15 = math.tanh %14 : vector<16x64xf32>
    %cst_8 = arith.constant 1.000000e+00 : f32
    %16 = vector.broadcast %cst_8 : f32 to vector<16x64xf32>
    %17 = arith.addf %16, %15 : vector<16x64xf32>
    %18 = arith.mulf %7, %17 : vector<16x64xf32>
    %19 = arith.truncf %18 : vector<16x64xf32> to vector<16x64xbf16>
    %c0_9 = arith.constant 0 : index
    %c0_10 = arith.constant 0 : index
    %20 = vector.load %arg4[%c0_9, %c0_10] : memref<64x32xbf16, #tpu.memory_space<vmem>>, vector<64x32xbf16>
    %cst_11 = arith.constant dense<0.000000e+00> : vector<16x32xf32>
    %21 = tpu.matmul %19, %20, %cst_11 {dimension_numbers = #tpu.dot_dimension_numbers<[1], [0], [0], [1], [0, 0, 1, 1], [], []>} : vector<16x64xbf16>, vector<64x32xbf16>, vector<16x32xf32> -> vector<16x32xf32>
    %c0_12 = arith.constant 0 : index
    %c0_13 = arith.constant 0 : index
    %22 = vector.load %arg5[%c0_12, %c0_13] : memref<1x32xf32, #tpu.memory_space<vmem>>, vector<1x32xf32>
    %23 = vector.broadcast %22 : vector<1x32xf32> to vector<16x32xf32>
    %24 = arith.addf %21, %23 : vector<16x32xf32>
    %25 = arith.extf %0 : vector<16x32xbf16> to vector<16x32xf32>
    %26 = arith.addf %24, %25 : vector<16x32xf32>
    %cst_14 = arith.constant dense<0.000000e+00> : vector<16xf32>
    %27 = vector.multi_reduction <add>, %26, %cst_14 [1] : vector<16x32xf32> to vector<16xf32>
    %28 = vector.shape_cast %27 : vector<16xf32> to vector<16x1xf32>
    %cst_15 = arith.constant 3.200000e+01 : f32
    %29 = vector.broadcast %cst_15 : f32 to vector<16x1xf32>
    %30 = arith.divf %28, %29 : vector<16x1xf32>
    %31 = vector.broadcast %30 : vector<16x1xf32> to vector<16x32xf32>
    %32 = arith.subf %26, %31 : vector<16x32xf32>
    %33 = arith.mulf %32, %32 : vector<16x32xf32>
    %cst_16 = arith.constant dense<0.000000e+00> : vector<16xf32>
    %34 = vector.multi_reduction <add>, %33, %cst_16 [1] : vector<16x32xf32> to vector<16xf32>
    %35 = vector.shape_cast %34 : vector<16xf32> to vector<16x1xf32>
    %cst_17 = arith.constant 3.200000e+01 : f32
    %36 = vector.broadcast %cst_17 : f32 to vector<16x1xf32>
    %37 = arith.divf %35, %36 : vector<16x1xf32>
    %cst_18 = arith.constant 9.99999996E-13 : f32
    %38 = vector.broadcast %cst_18 : f32 to vector<16x1xf32>
    %39 = arith.addf %37, %38 : vector<16x1xf32>
    %40 = math.rsqrt %39 : vector<16x1xf32>
    %41 = vector.broadcast %40 : vector<16x1xf32> to vector<16x32xf32>
    %42 = arith.mulf %32, %41 : vector<16x32xf32>
    %c0_19 = arith.constant 0 : index
    %c0_20 = arith.constant 0 : index
    %43 = vector.load %arg6[%c0_19, %c0_20] : memref<1x32xf32, #tpu.memory_space<vmem>>, vector<1x32xf32>
    %44 = vector.broadcast %43 : vector<1x32xf32> to vector<16x32xf32>
    %45 = arith.mulf %42, %44 : vector<16x32xf32>
    %c0_21 = arith.constant 0 : index
    %c0_22 = arith.constant 0 : index
    %46 = vector.load %arg7[%c0_21, %c0_22] : memref<1x32xf32, #tpu.memory_space<vmem>>, vector<1x32xf32>
    %47 = vector.broadcast %46 : vector<1x32xf32> to vector<16x32xf32>
    %48 = arith.addf %45, %47 : vector<16x32xf32>
    %49 = arith.truncf %48 : vector<16x32xf32> to vector<16x32xbf16>
    %c0_23 = arith.constant 0 : index
    %c0_24 = arith.constant 0 : index
    %50 = vector.load %arg8[%c0_23, %c0_24] : memref<16x32xbf16, #tpu.memory_space<vmem>>, vector<16x32xbf16>
    tpu.vector_store %arg8[%c0_23, %c0_24], %49 {strides = array<i32>} : memref<16x32xbf16, #tpu.memory_space<vmem>>, vector<16x32xbf16>,
    return
  }
  func.func @transform_0(%arg0: i32) -> (i32, i32) {
    %c0_i32 = arith.constant 0 : i32
    %c0_i32_0 = arith.constant 0 : i32
    return %arg0, %c0_i32 : i32, i32
  }
  func.func @transform_1(%arg0: i32) -> (i32, i32) {
    %c0_i32 = arith.constant 0 : i32
    %c0_i32_0 = arith.constant 0 : i32
    %c0_i32_1 = arith.constant 0 : i32
    return %c0_i32, %c0_i32_0 : i32, i32
  }
  func.func @transform_2(%arg0: i32) -> (i32, i32) {
    %c0_i32 = arith.constant 0 : i32
    %c0_i32_0 = arith.constant 0 : i32
    %c0_i32_1 = arith.constant 0 : i32
    return %c0_i32, %c0_i32_0 : i32, i32
  }
  func.func @transform_3(%arg0: i32) -> (i32, i32) {
    %c0_i32 = arith.constant 0 : i32
    %c0_i32_0 = arith.constant 0 : i32
    %c0_i32_1 = arith.constant 0 : i32
    return %c0_i32, %c0_i32_0 : i32, i32
  }
  func.func @transform_4(%arg0: i32) -> (i32, i32) {
    %c0_i32 = arith.constant 0 : i32
    %c0_i32_0 = arith.constant 0 : i32
    %c0_i32_1 = arith.constant 0 : i32
    return %c0_i32, %c0_i32_0 : i32, i32
  }
  func.func @transform_5(%arg0: i32) -> (i32, i32) {
    %c0_i32 = arith.constant 0 : i32
    %c0_i32_0 = arith.constant 0 : i32
    %c0_i32_1 = arith.constant 0 : i32
    return %c0_i32, %c0_i32_0 : i32, i32
  }
  func.func @transform_6(%arg0: i32) -> (i32, i32) {
    %c0_i32 = arith.constant 0 : i32
    %c0_i32_0 = arith.constant 0 : i32
    %c0_i32_1 = arith.constant 0 : i32
    return %c0_i32, %c0_i32_0 : i32, i32
  }
  func.func @transform_7(%arg0: i32) -> (i32, i32) {
    %c0_i32 = arith.constant 0 : i32
    %c0_i32_0 = arith.constant 0 : i32
    return %arg0, %c0_i32 : i32, i32
  }
}

</mosaic_0001>

<bundles_post_ra>
// kernel: chat_model_forward.7
= control target key start
LH: loop header
LB: loop body
LE: loop exit
PB: predicated region body
PF: predicated region fallthrough
CT: control target
= control target key end

     0   :  { %vm16_vm0 = vcmask 261120   ;;  %v98_v4 = vmov 32.0   ;;  %vm82_vm6 = vcmask 257024   ;;  %s141_s0 = inlined_call_operand.vmem [shape: f32[16,32], index: 0, kind: input, shape index: {}]   ;;  %s142_s1 = inlined_call_operand.vmem [shape: f32[1,32], index: 1, kind: input, shape index: {}]   ;;  %s143_s2 = inlined_call_operand.vmem [shape: f32[1,32], index: 2, kind: input, shape index: {}]   ;;  %s144_s3 = inlined_call_operand.vmem [shape: bf16[16,32], index: 3, kind: output, shape index: {}]  }
   0x1   :  { %v14_v0 = vld [vmem:[%s141_s0] sm:$0xff]  ;;  %v15_v2 = vld [vmem:[%s141_s0 + $0x8] sm:$0xff]  ;;  %92 = vrcp.f32 %v98_v4 }
   0x2   :  { %v17_v1 = vsel %vm16_vm0, %v14_v0, 0.0  ;;  %v20_v3 = vsel %vm16_vm0, %v15_v2, 0.0  ;;  %v90_v35 = vld [vmem:[%s142_s1] ss:$0 sm:$0xff] }
   0x3   :  { %18 = vadd.xlane.f32.xlu0 %v17_v1  ;;  %v91_v38 = vld [vmem:[%s143_s2] ss:$0 sm:$0xff] }
   0x7   :  { %v93_v5 = vpop.eup %92 }
   0x8   :  { %v24_v6 = vmul.f32 32.0, %v93_v5  ;;  %vm28_vm1 = vweird.f32 %v93_v5 }
   0xa   :  { %v25_v7 = vsub.f32 1.0, %v24_v6 }
   0xb   :  { %21 = vadd.xlane.f32.xlu0 %v20_v3 }
   0xc   :  { %v26_v8 = vmul.f32 %v93_v5, %v25_v7 }
   0xe   :  { %v27_v9 = vadd.f32 %v93_v5, %v26_v8 }
  0x10   :  { %v29_v10 = vsel %vm28_vm1, %v93_v5, %v27_v9 }
  0x76   :  { %v19_v11 = vpop.xlane.xlu0 %18 }
  0x77   :  { %v30_v12 = vmul.f32 %v29_v10, %v19_v11 }
  0x79   :  { %v32_v13 = vsub.f32 %v14_v0, %v30_v12 }
  0x7b   :  { %v34_v14 = vmul.f32 %v32_v13, %v32_v13 }
  0x7d   :  { %v36_v15 = vsel %vm16_vm0, %v34_v14, 0.0 }
  0x7e   :  { %37 = vadd.xlane.f32.xlu1 %v36_v15  ;;  %v22_v16 = vpop.xlane.xlu0 %21 }
  0x7f   :  { %v31_v17 = vmul.f32 %v29_v10, %v22_v16 }
  0x81   :  { %v33_v18 = vsub.f32 %v15_v2, %v31_v17 }
  0x83   :  { %v35_v19 = vmul.f32 %v33_v18, %v33_v18 }
  0x85   :  { %v39_v20 = vsel %vm16_vm0, %v35_v19, 0.0 }
  0x86   :  { %40 = vadd.xlane.f32.xlu1 %v39_v20 }
  0xf1   :  { %v38_v21 = vpop.xlane.xlu1 %37 }
  0xf2   :  { %v42_v22 = vmul.f32 %v38_v21, %v29_v10 }
  0xf4   :  { %v44_v23 = vadd.f32 1e-12, %v42_v22 }
  0xf6   :  { %94 = vrsqrt.f32 %v44_v23  ;;  %vm52_vm3 = vweird.f32 %v44_v23 }
  0xf9   :  { %v41_v24 = vpop.xlane.xlu1 %40 }
  0xfa   :  { %v43_v25 = vmul.f32 %v41_v24, %v29_v10 }
  0xfc   :  { %v95_v26 = vpop.eup %94  ;;  %v45_v27 = vadd.f32 1e-12, %v43_v25 }
  0xfd   :  { %v47_v28 = vmul.f32 %v95_v26, %v44_v23  ;;  %vm53_vm2 = vweird.f32 %v95_v26 }
  0xfe   :  { %96 = vrsqrt.f32 %v45_v27  ;;  %vm54_vm4 = vmor %vm52_vm3, %vm53_vm2  ;;  %vm62_vm7 = vweird.f32 %v45_v27 }
  0xff   :  { %v48_v29 = vmul.f32 %v95_v26, %v47_v28 }
 0x101   :  { %v49_v30 = vmul.f32 0.5, %v48_v29 }
 0x103   :  { %v50_v31 = vsub.f32 1.5, %v49_v30 }
 0x104   :  { %v97_v32 = vpop.eup %96 }
 0x105   :  { %v51_v33 = vmul.f32 %v95_v26, %v50_v31  ;;  %v57_v34 = vmul.f32 %v97_v32, %v45_v27  ;;  %vm63_vm5 = vweird.f32 %v97_v32 }
 0x106   :  { %vm64_vm8 = vmor %vm62_vm7, %vm63_vm5 }
 0x107   :  { %v55_v36 = vsel %vm54_vm4, %v95_v26, %v51_v33  ;;  %v58_v37 = vmul.f32 %v97_v32, %v57_v34 }
 0x108   :  { %v66_v39 = vmul.f32 %v55_v36, %v32_v13 }
 0x109   :  { %v59_v40 = vmul.f32 0.5, %v58_v37 }
 0x10a   :  { %v72_v41 = vmul.f32 %v90_v35, %v66_v39 }
 0x10b   :  { %v60_v42 = vsub.f32 1.5, %v59_v40 }
 0x10c   :  { %v78_v43 = vadd.f32 %v91_v38, %v72_v41 }
 0x10d   :  { %v61_v44 = vmul.f32 %v97_v32, %v60_v42 }
 0x10e   :  { %v80_v45 = vpack.c.bf16 %v78_v43, %v78_v43 }
 0x10f   :  { %v65_v46 = vsel %vm64_vm8, %v97_v32, %v61_v44 }
 0x110   :  { %83 = vst.msk [vmem:[%s144_s3] sm:$0xf] %vm82_vm6, %v80_v45  ;;  %v67_v47 = vmul.f32 %v65_v46, %v33_v18 }
 0x112   :  { %v73_v48 = vmul.f32 %v90_v35, %v67_v47 }
 0x114   :  { %v79_v49 = vadd.f32 %v91_v38, %v73_v48 }
 0x116   :  { %v81_v50 = vpack.c.bf16 %v79_v49, %v79_v49 }
 0x118   :  { %84 = vst.msk [vmem:[%s144_s3 + $0x4] sm:$0xf] %vm82_vm6, %v81_v50 }

// kernel: chat_model_forward.9
= control target key start
LH: loop header
LB: loop body
LE: loop exit
PB: predicated region body
PF: predicated region fallthrough
CT: control target
= control target key end

     0   :  { %vm51_vm0 = vcmask 261120   ;;  %v177_v15 = vmov 32.0   ;;  %vm140_vm6 = vcmask 257024   ;;  %s245_s1 = inlined_call_operand.vmem [shape: bf16[32,32], index: 1, kind: input, shape index: {}]   ;;  %s246_s2 = inlined_call_operand.vmem [shape: f32[1,32], index: 2, kind: input, shape index: {}]   ;;  %s247_s0 = inlined_call_operand.vmem [shape: bf16[16,32], index: 0, kind: input, shape index: {}]   ;;  %s248_s3 = inlined_call_operand.vmem [shape: bf16[16,32], index: 3, kind: input, shape index: {}]   ;;  %s249_s4 = inlined_call_operand.vmem [shape: f32[1,32], index: 4, kind: input, shape index: {}]   ;;  %s250_s5 = inlined_call_operand.vmem [shape: f32[1,32], index: 5, kind: input, shape index: {}]   ;;  %s251_s6 = inlined_call_operand.vmem [shape: bf16[16,32], index: 6, kind: output, shape index: {}]  }
   0x1   :  { %v162_v0 = vld [vmem:[%s245_s1 + $0x8] sm:$0xff]  ;;  %v161_v1 = vld [vmem:[%s245_s1] sm:$0xff]  ;;  %171 = vrcp.f32 %v177_v15 }
   0x2   :  { %61 = vmatpush.bf16.msra.mxu0 %v162_v0  ;;  %v160_v2 = vld [vmem:[%s247_s0] sm:$0xff] }
   0x3   :  { %v164_v3 = vld [vmem:[%s248_s3] sm:$0xff]  }
   0x4   :  { %v168_v4 = vld [vmem:[%s246_s2] ss:$0 sm:$0xff]  ;;  %v165_v5 = vunpack.c.l.bf16 %v164_v3  ;;  %v166_v10 = vunpack.c.h.bf16 %v164_v3 }
   0x5   :  { %v169_v46 = vld [vmem:[%s249_s4] ss:$0 sm:$0xff] }
   0x6   :  { %62 = vmatpush.bf16.msra.mxu0 %v161_v1  ;;  %v170_v49 = vld [vmem:[%s250_s5] ss:$0 sm:$0xff] }
   0x7   :  { %v172_v16 = vpop.eup %171 }
   0x8   :  { %v82_v17 = vmul.f32 32.0, %v172_v16  ;;  %vm86_vm1 = vweird.f32 %v172_v16 }
   0x9   :  { %159 = vmatmul.msk.bf16.vlgmr.msra.gmra.mxu0 %vm51_vm0, %v160_v2 }
   0xa   :  { %v83_v18 = vsub.f32 1.0, %v82_v17 }
   0xc   :  { %v84_v19 = vmul.f32 %v172_v16, %v83_v18 }
   0xe   :  { %v85_v20 = vadd.f32 %v172_v16, %v84_v19 }
  0x10   :  { %v87_v21 = vsel %vm86_vm1, %v172_v16, %v85_v20 }
  0x86   :  { %v64_v6 = vpop.f32.mrf.mxu0 }
  0x87   :  { %v65_v7 = vadd.f32 %v168_v4, %v64_v6 }
  0x89   :  { %v73_v8 = vadd.f32 %v165_v5, %v65_v7 }
  0x8b   :  { %v75_v9 = vsel %vm51_vm0, %v73_v8, 0.0 }
  0x8c   :  { %76 = vadd.xlane.f32.xlu0 %v75_v9 }
  0x8e   :  { %v66_v11 = vpop.f32.mrf.mxu0 }
  0x8f   :  { %v67_v12 = vadd.f32 %v168_v4, %v66_v11 }
  0x91   :  { %v74_v13 = vadd.f32 %v166_v10, %v67_v12 }
  0x93   :  { %v78_v14 = vsel %vm51_vm0, %v74_v13, 0.0 }
  0x94   :  { %79 = vadd.xlane.f32.xlu0 %v78_v14 }
  0xff   :  { %v77_v22 = vpop.xlane.xlu0 %76 }
 0x100   :  { %v88_v23 = vmul.f32 %v87_v21, %v77_v22 }
 0x102   :  { %v90_v24 = vsub.f32 %v73_v8, %v88_v23 }
 0x104   :  { %v92_v25 = vmul.f32 %v90_v24, %v90_v24 }
 0x106   :  { %v94_v26 = vsel %vm51_vm0, %v92_v25, 0.0 }
 0x107   :  { %95 = vadd.xlane.f32.xlu1 %v94_v26  ;;  %v80_v27 = vpop.xlane.xlu0 %79 }
 0x108   :  { %v89_v28 = vmul.f32 %v87_v21, %v80_v27 }
 0x10a   :  { %v91_v29 = vsub.f32 %v74_v13, %v89_v28 }
 0x10c   :  { %v93_v30 = vmul.f32 %v91_v29, %v91_v29 }
 0x10e   :  { %v97_v31 = vsel %vm51_vm0, %v93_v30, 0.0 }
 0x10f   :  { %98 = vadd.xlane.f32.xlu1 %v97_v31 }
 0x17a   :  { %v96_v32 = vpop.xlane.xlu1 %95 }
 0x17b   :  { %v100_v33 = vmul.f32 %v96_v32, %v87_v21 }
 0x17d   :  { %v102_v34 = vadd.f32 1e-12, %v100_v33 }
 0x17f   :  { %173 = vrsqrt.f32 %v102_v34  ;;  %vm110_vm3 = vweird.f32 %v102_v34 }
 0x182   :  { %v99_v35 = vpop.xlane.xlu1 %98 }
 0x183   :  { %v101_v36 = vmul.f32 %v99_v35, %v87_v21 }
 0x185   :  { %v174_v37 = vpop.eup %173  ;;  %v103_v38 = vadd.f32 1e-12, %v101_v36 }
 0x186   :  { %v105_v39 = vmul.f32 %v174_v37, %v102_v34  ;;  %vm111_vm2 = vweird.f32 %v174_v37 }
 0x187   :  { %175 = vrsqrt.f32 %v103_v38  ;;  %vm112_vm4 = vmor %vm110_vm3, %vm111_vm2  ;;  %vm120_vm7 = vweird.f32 %v103_v38 }
 0x188   :  { %v106_v40 = vmul.f32 %v174_v37, %v105_v39 }
 0x18a   :  { %v107_v41 = vmul.f32 0.5, %v106_v40 }
 0x18c   :  { %v108_v42 = vsub.f32 1.5, %v107_v41 }
 0x18d   :  { %v176_v43 = vpop.eup %175 }
 0x18e   :  { %v109_v44 = vmul.f32 %v174_v37, %v108_v42  ;;  %v115_v45 = vmul.f32 %v176_v43, %v103_v38  ;;  %vm121_vm5 = vweird.f32 %v176_v43 }
 0x18f   :  { %vm122_vm8 = vmor %vm120_vm7, %vm121_vm5 }
 0x190   :  { %v113_v47 = vsel %vm112_vm4, %v174_v37, %v109_v44  ;;  %v116_v48 = vmul.f32 %v176_v43, %v115_v45 }
 0x191   :  { %v124_v50 = vmul.f32 %v113_v47, %v90_v24 }
 0x192   :  { %v117_v51 = vmul.f32 0.5, %v116_v48 }
 0x193   :  { %v130_v52 = vmul.f32 %v169_v46, %v124_v50 }
 0x194   :  { %v118_v53 = vsub.f32 1.5, %v117_v51 }
 0x195   :  { %v136_v54 = vadd.f32 %v170_v49, %v130_v52 }
 0x196   :  { %v119_v55 = vmul.f32 %v176_v43, %v118_v53 }
 0x197   :  { %v138_v56 = vpack.c.bf16 %v136_v54, %v136_v54 }
 0x198   :  { %v123_v57 = vsel %vm122_vm8, %v176_v43, %v119_v55 }
 0x199   :  { %141 = vst.msk [vmem:[%s251_s6] sm:$0xf] %vm140_vm6, %v138_v56  ;;  %v125_v58 = vmul.f32 %v123_v57, %v91_v29 }
 0x19b   :  { %v131_v59 = vmul.f32 %v169_v46, %v125_v58 }
 0x19d   :  { %v137_v60 = vadd.f32 %v170_v49, %v131_v59 }
 0x19f   :  { %v139_v61 = vpack.c.bf16 %v137_v60, %v137_v60 }
 0x1a1   :  { %142 = vst.msk [vmem:[%s251_s6 + $0x4] sm:$0xf] %vm140_vm6, %v139_v61 }

// kernel: chat_model_forward.8
= control target key start
LH: loop header
LB: loop body
LE: loop exit
PB: predicated region body
PF: predicated region fallthrough
CT: control target
= control target key end

     0   :  { %s685_s15 = smov 0   ;;  %s766_s0 = inlined_call_operand.vmem [shape: bf16[2,8,32], index: 0, kind: input, shape index: {}]   ;;  %s767_s1 = inlined_call_operand.vmem [shape: bf16[32,96], index: 1, kind: input, shape index: {}]   ;;  %s768_s2 = inlined_call_operand.vmem [shape: f32[1,96], index: 2, kind: input, shape index: {}]   ;;  %s769_s3 = inlined_call_operand.vmem [shape: f32[2,1,8], index: 3, kind: input, shape index: {}]   ;;  %s770_s4 = inlined_call_operand.vmem [shape: bf16[2,8,32], index: 4, kind: output, shape index: {}]  }
   0x1 LB: > { %s572_s16 = sadd.s32 4294967295, %s645_s15   ;;  %p576_p0 = scmp.ge.s32.totalorder %s645_s15, 1  ;;  %s645_s15 = sphi %s685_s15, %s14_s15  }
   0x2   : > { %p169_p1 = scmp.lt.s32.totalorder %s645_s15, 3 }
   0x4   : > { %p170_p2 = pnand %p576_p0, %p169_p1 }
   0x5   : > { %p196_p3 = scmp.lt.s32.totalorder (!%p170_p2), %s572_s16, 1  ;;  %s647_s30 = smov (!%p170_p2), 104  }
   0x6   : > { %173 = sbr.rel (%p170_p2) target bundleno = 939 (0x3ab), region = 36  ;;  %s648_s5 = smov (!%p170_p2), 120  }
   0x7   : > { %s649_s6 = smov (!%p170_p2), 96   ;;  %s650_s7 = smov (!%p170_p2), 80  }
   0x8   : > { %s651_s8 = smov (!%p170_p2), 72   ;;  %s652_s9 = smov (!%p170_p2), 88  }
   0x9   : > { %s653_s10 = smov (!%p170_p2), 64   ;;  %s654_s11 = smov (!%p170_p2), 112  }
   0xa   : > { %s655_s12 = smov (!%p170_p2), 56   ;;  %s656_s17 = smov (!%p170_p2), 40  }
   0xb   : > { %v599_v0 = vld [vmem:[%s767_s1 + $0x8] sm:$0xff]  ;;  %v598_v1 = vld [vmem:[%s767_s1] sm:$0xff]  ;;  %s772_s16 = smov (!%p196_p3, %s572_s16), 1  ;;  %vm229_vm0 = vcmask 261120   ;;  %vm256_vm1 = vcmask 64512   ;;  %vm295_vm2 = vcmask 1043456  }
   0xc   : > { %239 = vmatpush.bf16.msra.mxu0 %v599_v0  ;;  %s577_s21 = sshll.u32 %s772_s16, 2  ;;  %s202_s24 = scalar_lea.vmem %s769_s3, %s772_s16  ;;  %v622_v3 = vld [vmem:[%s768_s2] ss:$0 sm:$0xff]  ;;  %vm378_vm3 = vcmask 125952   ;;  %vm508_vm4 = vcmask 257152  }
   0xd   : > { %s199_s27 = scalar_lea.vmem %s766_s0, %s577_s21  ;;  %v621_v25 = vld [vmem:[%s202_s24] ss:$0 sm:$0xff]  ;;  %s657_s18 = smov 48  }
   0xe   : > { %v208_v2 = vld [vmem:[%s199_s27] sm:$0xf]  ;;  %s658_s19 = smov 8   ;;  %s659_s20 = smov 16  }
   0xf   : > { %s206_s24 = scalar_lea.vmem %s770_s4, %s577_s21 }
  0x10   : > { %240 = vmatpush.bf16.msra.mxu0 %v598_v1 }
  0x13   : > { %587 = vmatmul.msk.bf16.vlgmr.msra.gmra.mxu0 %vm229_vm0, %v208_v2 }
  0x90   : > { %v242_v4 = vpop.f32.mrf.mxu0 }
  0x91   : > { %v243_v5 = vadd.f32 %v622_v3, %v242_v4 }
  0x93   : > { %v246_v6 = vpack.c.bf16 %v243_v5, %v243_v5 }
  0x95   : > { %v252_v7 = vunpack.c.l.b16 %v246_v6 }
  0x97   : > { %v714_v8 = vpack.c.b16 %v252_v7, %v252_v7 }
  0x98   : > { %v244_v9 = vpop.f32.mrf.mxu0 }
  0x99   : > { %439 = vrot.lane.b32.xlu2 %v714_v8, %s647_s30  ;;  %313 = vrot.lane.b32.xlu1 %v714_v8, %s648_s5 }
  0x9a   : > { %254 = vrot.lane.b32.xlu0 %v714_v8, %s649_s6 }
  0xa1   : > { %382 = vrot.lane.b32.xlu2 %v714_v8, %s650_s7  ;;  %441 = vrot.lane.b32.xlu1 %v714_v8, %s651_s8 }
  0xa2   : > { %315 = vrot.lane.b32.xlu0 %v714_v8, %s652_s9 }
  0xa9   : > { %290 = vrot.lane.b32.xlu2 %v714_v8, %s653_s10 }
  0xaa   : > { %380 = vrot.lane.b32.xlu0 %v714_v8, %s654_s11 }
  0xb1   : > { %350 = vrot.lane.b32.xlu2 %v714_v8, %s655_s12 }
  0xf3   : > { %v440_v10 = vpop.permute.xlu2 %439 }
  0xfb   : > { %v383_v11 = vpop.permute.xlu2 %382 }
  0xfc   : > { %v388_v12 = vsel %vm256_vm1, %v383_v11, 0 }
  0xfd   : > { %397 = vmatpush.bf16.xpose.msrb.mxu0 %v388_v12 }
 0x103   : > { %v291_v13 = vpop.permute.xlu2 %290 }
 0x104   : > { %v297_v14 = vsel %vm295_vm2, %v291_v13, 0 }
 0x105   : > { %306 = vmatpush.bf16.msra.mxu2 %v297_v14 }
 0x10b   : > { %v351_v15 = vpop.permute.xlu2 %350  ;;  %v314_v16 = vpop.permute.xlu1 %313 }
 0x10c   : > { %v255_v17 = vpop.permute.xlu0 %254  ;;  %v356_v18 = vsel %vm295_vm2, %v351_v15, 0 }
 0x10d   : > { %v261_v19 = vsel %vm256_vm1, %v255_v17, 0  ;;  %365 = vmatpush.bf16.msrb.mxu2 %v356_v18 }
 0x10e   : > { %270 = vmatpush.bf16.xpose.msra.mxu1 %v261_v19 }
 0x113   : > { %v442_v20 = vpop.permute.xlu1 %441 }
 0x114   : > { %v316_v21 = vpop.permute.xlu0 %315  ;;  %v447_v22 = vsel %vm256_vm1, %v442_v20, 0 }
 0x115   : > { %588 = vmatmul.msk.bf16.vlgmr.msra.gmra.mxu1 %vm256_vm1, %v246_v6  ;;  %v321_v23 = vsel %vm256_vm1, %v316_v21, 0 }
 0x116   : > { %330 = vmatpush.bf16.xpose.msra.mxu3 %v321_v23 }
 0x11c   : > { %v381_v24 = vpop.permute.xlu0 %380 }
 0x11d   : > { %590 = vmatmul.msk.bf16.vlgmr.msra.gmra.mxu3 %vm256_vm1, %v314_v16  ;;  %592 = vmatmul.msk.bf16.vlgmr.msrb.gmra.mxu0 %vm256_vm1, %v381_v24 }
 0x11e   : > { %456 = vmatpush.bf16.xpose.msrb.mxu3 %v447_v22 }
 0x12d   : > { %594 = vmatmul.msk.bf16.vlgmr.msrb.gmra.mxu3 %vm256_vm1, %v440_v10 }
 0x192   : > { %v272_v26 = vpop.f32.mrf.mxu1 }
 0x193   : > { %v273_v27 = vadd.f32 %v621_v25, %v272_v26 }
 0x195   : > { %v276_v28 = vsel %vm256_vm1, %v273_v27, -inf }
 0x196   : > { %277 = vmax.xlane.f32.xlu1 %v276_v28 }
 0x19a   : > { %v274_v29 = vpop.f32.mrf.mxu1  ;;  %v399_v30 = vpop.f32.mrf.mxu0 }
 0x19b   : > { %v400_v35 = vadd.f32 %v621_v25, %v399_v30 }
 0x19d   : > { %v403_v37 = vsel %vm256_vm1, %v400_v35, -inf }
 0x1a0   : > { %v332_v31 = vpop.f32.mrf.mxu3 }
 0x1a1   : > { %v333_v32 = vadd.f32 %v621_v25, %v332_v31 }
 0x1a2   : > { %v401_v33 = vpop.f32.mrf.mxu0 }
 0x1a3   : > { %v336_v34 = vsel %vm256_vm1, %v333_v32, -inf }
 0x1a4   : > { %337 = vmax.xlane.f32.xlu0 %v336_v34 }
 0x1a8   : > { %v334_v36 = vpop.f32.mrf.mxu3 }
 0x1ac   : > { %404 = vmax.xlane.f32.xlu0 %v403_v37 }
 0x1af   : > { %476 = vrot.lane.b32.xlu1 %v714_v8, %s656_s17 }
 0x1b0   : > { %v458_v38 = vpop.f32.mrf.mxu3 }
 0x1b1   : > { %v459_v39 = vadd.f32 %v621_v25, %v458_v38 }
 0x1b3   : > { %v462_v40 = vsel %vm256_vm1, %v459_v39, -inf }
 0x1b4   : > { %463 = vmax.xlane.f32.xlu2 %v462_v40 }
 0x1b8   : > { %v460_v41 = vpop.f32.mrf.mxu3 }
 0x1cc   : > { %417 = vrot.lane.b32.xlu2 %v714_v8, %s657_s18 }
 0x209   : > { %v278_v42 = vpop.xlane.xlu1 %277 }
 0x20a   : > { %v279_v43 = vsub.f32 %v273_v27, %v278_v42 }
 0x20c   : > { %v280_v44 = vpack.c.bf16 %v279_v43, %v279_v43 }
 0x20e   : > { %v281_v45 = vunpack.c.l.bf16 %v280_v44 }
 0x210   : > { %v282_v46 = vmul.f32 1.442695, %v281_v45 }
 0x212   : > { %623 = vpow2.f32 %v282_v46 }
 0x217   : > { %v338_v47 = vpop.xlane.xlu0 %337 }
 0x218   : > { %v624_v48 = vpop.eup %623  ;;  %v339_v49 = vsub.f32 %v333_v32, %v338_v47 }
 0x219   : > { %v284_v50 = vpack.c.bf16 %v624_v48, %v624_v48 }
 0x21a   : > { %v340_v51 = vpack.c.bf16 %v339_v49, %v339_v49 }
 0x21b   : > { %589 = vmatmul.msk.bf16.vlgmr.msra.gmra.mxu2 %vm256_vm1, %v284_v50  ;;  %v285_v52 = vunpack.c.l.bf16 %v284_v50 }
 0x21c   : > { %v341_v53 = vunpack.c.l.bf16 %v340_v51 }
 0x21d   : > { %v286_v54 = vsel %vm256_vm1, %v285_v52, 0.0 }
 0x21e   : > { %v342_v55 = vmul.f32 1.442695, %v341_v53  ;;  %287 = vadd.xlane.f32.xlu2 %v286_v54 }
 0x21f   : > { %v405_v56 = vpop.xlane.xlu0 %404 }
 0x220   : > { %625 = vpow2.f32 %v342_v55  ;;  %v406_v57 = vsub.f32 %v400_v35, %v405_v56 }
 0x221   : > { %v477_v58 = vpop.permute.xlu1 %476 }
 0x222   : > { %v407_v59 = vpack.c.bf16 %v406_v57, %v406_v57  ;;  %v482_v60 = vsel %vm295_vm2, %v477_v58, 0 }
 0x223   : > { %491 = vmatpush.bf16.msra.mxu2 %v482_v60 }
 0x224   : > { %v408_v61 = vunpack.c.l.bf16 %v407_v59 }
 0x226   : > { %v626_v62 = vpop.eup %625  ;;  %v409_v63 = vmul.f32 1.442695, %v408_v61 }
 0x227   : > { %v464_v0 = vpop.xlane.xlu2 %463  ;;  %v344_v2 = vpack.c.bf16 %v626_v62, %v626_v62 }
 0x228   : > { %627 = vpow2.f32 %v409_v63  ;;  %v465_v1 = vsub.f32 %v459_v39, %v464_v0 }
 0x229   : > { %v345_v16 = vunpack.c.l.bf16 %v344_v2 }
 0x22a   : > { %v466_v3 = vpack.c.bf16 %v465_v1, %v465_v1 }
 0x22b   : > { %591 = vmatmul.msk.bf16.vlgmr.msrb.gmra.mxu2 %vm256_vm1, %v344_v2  ;;  %v346_v17 = vsel %vm256_vm1, %v345_v16, 0.0 }
 0x22c   : > { %v467_v4 = vunpack.c.l.bf16 %v466_v3 }
 0x22e   : > { %v628_v5 = vpop.eup %627  ;;  %v468_v6 = vmul.f32 1.442695, %v467_v4 }
 0x22f   : > { %v411_v7 = vpack.c.bf16 %v628_v5, %v628_v5  ;;  %v418_v8 = vpop.permute.xlu2 %417 }
 0x230   : > { %629 = vpow2.f32 %v468_v6  ;;  %v423_v9 = vsel %vm295_vm2, %v418_v8, 0 }
 0x231   : > { %432 = vmatpush.bf16.msrb.mxu1 %v423_v9  ;;  %v412_v10 = vunpack.c.l.bf16 %v411_v7 }
 0x233   : > { %v413_v11 = vsel %vm256_vm1, %v412_v10, 0.0 }
 0x234   : > { %593 = vmatmul.msk.bf16.vlgmr.msrb.gmra.mxu1 %vm256_vm1, %v411_v7  ;;  %414 = vadd.xlane.f32.xlu1 %v413_v11 }
 0x236   : > { %v630_v12 = vpop.eup %629 }
 0x237   : > { %v470_v13 = vpack.c.bf16 %v630_v12, %v630_v12 }
 0x239   : > { %v471_v14 = vunpack.c.l.bf16 %v470_v13 }
 0x23b   : > { %595 = vmatmul.msk.bf16.vlgmr.msra.gmra.mxu2 %vm256_vm1, %v470_v13  ;;  %v472_v15 = vsel %vm256_vm1, %v471_v14, 0.0 }
 0x23c   : > { %473 = vadd.xlane.f32.xlu0 %v472_v15 }
 0x244   : > { %347 = vadd.xlane.f32.xlu0 %v346_v17 }
 0x291   : > { %v288_v33 = vpop.xlane.xlu2 %287 }
 0x29e   : > { %v308_v18 = vpop.f32.mrf.mxu2 }
 0x2a6   : > { %v310_v19 = vpop.f32.mrf.mxu2 }
 0x2a7   : > { %v415_v32 = vpop.xlane.xlu1 %414 }
 0x2ae   : > { %v367_v20 = vpop.f32.mrf.mxu2 }
 0x2af   : > { %v474_v21 = vpop.xlane.xlu0 %473 }
 0x2b0   : > { %631 = vrcp.f32 %v474_v21 }
 0x2b1   : > { %v434_v22 = vpop.f32.mrf.mxu1 }
 0x2b6   : > { %v369_v23 = vpop.f32.mrf.mxu2  ;;  %v632_v26 = vpop.eup %631 }
 0x2b7   : > { %v348_v25 = vpop.xlane.xlu0 %347 }
 0x2b8   : > { %633 = vrcp.f32 %v348_v25 }
 0x2b9   : > { %v436_v24 = vpop.f32.mrf.mxu1  ;;  %635 = vrcp.f32 %v415_v32 }
 0x2ba   : > { %637 = vrcp.f32 %v288_v33 }
 0x2be   : > { %v493_v27 = vpop.f32.mrf.mxu2  ;;  %v634_v29 = vpop.eup %633 }
 0x2bf   : > { %v497_v28 = vmul.f32 %v632_v26, %v493_v27  ;;  %v371_v31 = vmul.f32 %v634_v29, %v367_v20  ;;  %v636_v34 = vpop.eup %635 }
 0x2c0   : > { %v438_v35 = vmul.f32 %v636_v34, %v434_v22  ;;  %v638_v39 = vpop.eup %637 }
 0x2c1   : > { %499 = vrot.lane.b32.xlu0 %v497_v28, %s658_s19  ;;  %v312_v40 = vmul.f32 %v638_v39, %v308_v18 }
 0x2c6   : > { %v495_v30 = vpop.f32.mrf.mxu2 }
 0x2c9   : > { %373 = vrot.lane.b32.xlu0 %v371_v31, %s658_s19 }
 0x333   : > { %v500_v36 = vpop.permute.xlu0 %499 }
 0x334   : > { %v502_v37 = vsel %vm256_vm1, %v438_v35, %v500_v36 }
 0x335   : > { %v503_v38 = vpack.c.bf16 %v502_v37, %v502_v37 }
 0x337   : > { %505 = vrot.lane.b32.xlu0 %v503_v38, %s659_s20 }
 0x33b   : > { %v374_v41 = vpop.permute.xlu0 %373 }
 0x33c   : > { %v376_v42 = vsel %vm256_vm1, %v312_v40, %v374_v41 }
 0x33d   : > { %v377_v43 = vpack.c.bf16 %v376_v42, %v376_v42 }
 0x33f   : > { %379 = vst.msk [vmem:[%s206_s24] sm:$0xf] %vm378_vm3, %v377_v43 }
 0x3a9   : > { %v506_v44 = vpop.permute.xlu0 %505 }
 0x3aa   : > { %509 = vst.msk [vmem:[%s206_s24] sm:$0xf] %vm508_vm4, %v506_v44 }
 0x3ab PF: > { %s14_s15 = sadd.s32 1, %s645_s15  }
 0x3ac   : > { %p11_p4 = scmp.ge.s32.totalorder %s14_s15, 4  }
 0x3ae   :  { %13 = sbr.rel (!%p11_p4) target bundleno = 1 (0x1), region = 69 }

// kernel: chat_model_forward.10
= control target key start
LH: loop header
LB: loop body
LE: loop exit
PB: predicated region body
PF: predicated region fallthrough
CT: control target
= control target key end

     0   :  { %vm54_vm0 = vcmask 261120   ;;  %vm127_vm1 = vcmask 523264   ;;  %v273_v43 = vmov 32.0   ;;  %vm214_vm7 = vcmask 257024   ;;  %s361_s1 = inlined_call_operand.vmem [shape: bf16[32,64], index: 1, kind: input, shape index: {}]   ;;  %s362_s2 = inlined_call_operand.vmem [shape: f32[1,64], index: 2, kind: input, shape index: {}]   ;;  %s363_s0 = inlined_call_operand.vmem [shape: bf16[16,32], index: 0, kind: input, shape index: {}]   ;;  %s364_s4 = inlined_call_operand.vmem [shape: f32[1,32], index: 4, kind: input, shape index: {}]   ;;  %s365_s3 = inlined_call_operand.vmem [shape: bf16[64,32], index: 3, kind: input, shape index: {}]   ;;  %s366_s5 = inlined_call_operand.vmem [shape: f32[1,32], index: 5, kind: input, shape index: {}]   ;;  %s367_s6 = inlined_call_operand.vmem [shape: f32[1,32], index: 6, kind: input, shape index: {}]   ;;  %s368_s7 = inlined_call_operand.vmem [shape: bf16[16,32], index: 7, kind: output, shape index: {}]  }
   0x1   :  { %v253_v0 = vld [vmem:[%s361_s1 + $0x8] sm:$0xff]  ;;  %v252_v1 = vld [vmem:[%s361_s1] sm:$0xff]  ;;  %v257_v3 = vld [vmem:[%s365_s3 + $0x18] sm:$0xff] }
   0x2   :  { %64 = vmatpush.bf16.msra.mxu0 %v253_v0  ;;  %v251_v2 = vld [vmem:[%s363_s0] sm:$0xff]  ;;  %135 = vmatpush.bf16.msra.mxu1 %v257_v3  ;;  %v256_v4 = vld [vmem:[%s365_s3 + $0x10] sm:$0xff]  ;;  %v255_v5 = vld [vmem:[%s365_s3 + $0x8] sm:$0xff] }
   0x3   :  { %v254_v6 = vld [vmem:[%s365_s3] sm:$0xff] }
   0x4   :  { %v259_v7 = vld [vmem:[%s362_s2] ss:$0 sm:$0xff] }
   0x5   :  { %v27_v31 = vld [vmem:[%s363_s0] sm:$0xff]  }
   0x6   :  { %65 = vmatpush.bf16.msra.mxu0 %v252_v1  ;;  %136 = vmatpush.bf16.msra.mxu1 %v256_v4  ;;  %v260_v32 = vld [vmem:[%s364_s4] ss:$0 sm:$0xff]  ;;  %v145_v33 = vunpack.c.l.bf16 %v27_v31  ;;  %v146_v38 = vunpack.c.h.bf16 %v27_v31 }
   0x9   :  { %233 = vmatmul.msk.bf16.vlgmr.msra.gmra.mxu0 %vm54_vm0, %v251_v2 }
   0xa   :  { %137 = vmatpush.bf16.msra.mxu1 %v255_v5 }
   0xe   :  { %138 = vmatpush.bf16.msra.mxu1 %v254_v6 }
  0x86   :  { %v67_v8 = vpop.f32.mrf.mxu0 }
  0x87   :  { %v68_v9 = vadd.f32 %v259_v7, %v67_v8 }
  0x89   :  { %v74_v10 = vmul.f32 0.044715, %v68_v9  ;;  %v72_v25 = vmul.f32 0.5, %v68_v9 }
  0x8b   :  { %v76_v11 = vmul.f32 %v74_v10, %v68_v9  ;;  %v261_v10 = vld [vmem:[%s366_s5] ss:$0 sm:$0xff] }
  0x8d   :  { %v78_v12 = vmul.f32 %v76_v11, %v68_v9 }
  0x8e   :  { %v69_v13 = vpop.f32.mrf.mxu0 }
  0x8f   :  { %v70_v14 = vadd.f32 %v259_v7, %v69_v13  ;;  %v80_v15 = vadd.f32 %v78_v12, %v68_v9  ;;  %v262_v13 = vld [vmem:[%s367_s6] ss:$0 sm:$0xff] }
  0x91   :  { %v75_v16 = vmul.f32 0.044715, %v70_v14  ;;  %v82_v18 = vmul.f32 0.7978846, %v80_v15  ;;  %v73_v26 = vmul.f32 0.5, %v70_v14 }
  0x93   :  { %v77_v17 = vmul.f32 %v75_v16, %v70_v14  ;;  %263 = vtanh.f32 %v82_v18 }
  0x95   :  { %v79_v19 = vmul.f32 %v77_v17, %v70_v14 }
  0x97   :  { %v81_v20 = vadd.f32 %v79_v19, %v70_v14 }
  0x99   :  { %v83_v21 = vmul.f32 0.7978846, %v81_v20  ;;  %v264_v22 = vpop.eup %263 }
  0x9a   :  { %v86_v23 = vadd.f32 1.0, %v264_v22 }
  0x9b   :  { %265 = vtanh.f32 %v83_v21 }
  0x9c   :  { %v88_v28 = vmul.f32 %v86_v23, %v72_v25  ;;  %267 = vrcp.f32 %v273_v43 }
  0xa1   :  { %v266_v24 = vpop.eup %265 }
  0xa2   :  { %v87_v27 = vadd.f32 1.0, %v266_v24  ;;  %v268_v44 = vpop.eup %267 }
  0xa3   :  { %v156_v45 = vmul.f32 32.0, %v268_v44  ;;  %vm160_vm2 = vweird.f32 %v268_v44 }
  0xa4   :  { %v89_v29 = vmul.f32 %v87_v27, %v73_v26 }
  0xa5   :  { %v157_v46 = vsub.f32 1.0, %v156_v45 }
  0xa6   :  { %v90_v30 = vpack.c.bf16 %v89_v29, %v88_v28 }
  0xa7   :  { %v158_v47 = vmul.f32 %v268_v44, %v157_v46 }
  0xa8   :  { %250 = vmatmul.msk.bf16.vlgmr.msra.gmra.mxu1 %vm127_vm1, %v90_v30 }
  0xa9   :  { %v159_v48 = vadd.f32 %v268_v44, %v158_v47 }
  0xab   :  { %v161_v49 = vsel %vm160_vm2, %v268_v44, %v159_v48 }
 0x125   :  { %v140_v34 = vpop.f32.mrf.mxu1 }
 0x126   :  { %v141_v35 = vadd.f32 %v260_v32, %v140_v34 }
 0x128   :  { %v147_v36 = vadd.f32 %v145_v33, %v141_v35 }
 0x12a   :  { %v149_v37 = vsel %vm54_vm0, %v147_v36, 0.0 }
 0x12b   :  { %150 = vadd.xlane.f32.xlu0 %v149_v37 }
 0x12d   :  { %v142_v39 = vpop.f32.mrf.mxu1 }
 0x12e   :  { %v143_v40 = vadd.f32 %v260_v32, %v142_v39 }
 0x130   :  { %v148_v41 = vadd.f32 %v146_v38, %v143_v40 }
 0x132   :  { %v152_v42 = vsel %vm54_vm0, %v148_v41, 0.0 }
 0x133   :  { %153 = vadd.xlane.f32.xlu0 %v152_v42 }
 0x19e   :  { %v151_v50 = vpop.xlane.xlu0 %150 }
 0x19f   :  { %v162_v51 = vmul.f32 %v161_v49, %v151_v50 }
 0x1a1   :  { %v164_v52 = vsub.f32 %v147_v36, %v162_v51 }
 0x1a3   :  { %v166_v53 = vmul.f32 %v164_v52, %v164_v52 }
 0x1a5   :  { %v168_v54 = vsel %vm54_vm0, %v166_v53, 0.0 }
 0x1a6   :  { %169 = vadd.xlane.f32.xlu1 %v168_v54  ;;  %v154_v55 = vpop.xlane.xlu0 %153 }
 0x1a7   :  { %v163_v56 = vmul.f32 %v161_v49, %v154_v55 }
 0x1a9   :  { %v165_v57 = vsub.f32 %v148_v41, %v163_v56 }
 0x1ab   :  { %v167_v58 = vmul.f32 %v165_v57, %v165_v57 }
 0x1ad   :  { %v171_v59 = vsel %vm54_vm0, %v167_v58, 0.0 }
 0x1ae   :  { %172 = vadd.xlane.f32.xlu1 %v171_v59 }
 0x219   :  { %v170_v60 = vpop.xlane.xlu1 %169 }
 0x21a   :  { %v174_v61 = vmul.f32 %v170_v60, %v161_v49 }
 0x21c   :  { %v176_v62 = vadd.f32 1e-12, %v174_v61 }
 0x21e   :  { %269 = vrsqrt.f32 %v176_v62  ;;  %vm184_vm4 = vweird.f32 %v176_v62 }
 0x221   :  { %v173_v63 = vpop.xlane.xlu1 %172 }
 0x222   :  { %v175_v0 = vmul.f32 %v173_v63, %v161_v49 }
 0x224   :  { %v270_v1 = vpop.eup %269  ;;  %v177_v2 = vadd.f32 1e-12, %v175_v0 }
 0x225   :  { %v179_v3 = vmul.f32 %v270_v1, %v176_v62  ;;  %vm185_vm3 = vweird.f32 %v270_v1 }
 0x226   :  { %271 = vrsqrt.f32 %v177_v2  ;;  %vm186_vm5 = vmor %vm184_vm4, %vm185_vm3  ;;  %vm194_vm8 = vweird.f32 %v177_v2 }
 0x227   :  { %v180_v4 = vmul.f32 %v270_v1, %v179_v3 }
 0x229   :  { %v181_v5 = vmul.f32 0.5, %v180_v4 }
 0x22b   :  { %v182_v6 = vsub.f32 1.5, %v181_v5 }
 0x22c   :  { %v272_v7 = vpop.eup %271 }
 0x22d   :  { %v183_v8 = vmul.f32 %v270_v1, %v182_v6  ;;  %v189_v9 = vmul.f32 %v272_v7, %v177_v2  ;;  %vm195_vm6 = vweird.f32 %v272_v7 }
 0x22e   :  { %vm196_vm9 = vmor %vm194_vm8, %vm195_vm6 }
 0x22f   :  { %v187_v11 = vsel %vm186_vm5, %v270_v1, %v183_v8  ;;  %v190_v12 = vmul.f32 %v272_v7, %v189_v9 }
 0x230   :  { %v198_v14 = vmul.f32 %v187_v11, %v164_v52 }
 0x231   :  { %v191_v15 = vmul.f32 0.5, %v190_v12 }
 0x232   :  { %v204_v16 = vmul.f32 %v261_v10, %v198_v14 }
 0x233   :  { %v192_v17 = vsub.f32 1.5, %v191_v15 }
 0x234   :  { %v210_v18 = vadd.f32 %v262_v13, %v204_v16 }
 0x235   :  { %v193_v19 = vmul.f32 %v272_v7, %v192_v17 }
 0x236   :  { %v212_v20 = vpack.c.bf16 %v210_v18, %v210_v18 }
 0x237   :  { %v197_v21 = vsel %vm196_vm9, %v272_v7, %v193_v19 }
 0x238   :  { %215 = vst.msk [vmem:[%s368_s7] sm:$0xf] %vm214_vm7, %v212_v20  ;;  %v199_v22 = vmul.f32 %v197_v21, %v165_v57 }
 0x23a   :  { %v205_v23 = vmul.f32 %v261_v10, %v199_v22 }
 0x23c   :  { %v211_v24 = vadd.f32 %v262_v13, %v205_v23 }
 0x23e   :  { %v213_v25 = vpack.c.bf16 %v211_v24, %v211_v24 }
 0x240   :  { %216 = vst.msk [vmem:[%s368_s7 + $0x4] sm:$0xf] %vm214_vm7, %v213_v25 }

</bundles_post_ra>
